<compile_context>
chip_gen: v6e
topology: v6e:2x2x1
jax: 0.10.0
libtpu: 0.0.40
codegen_flags: <defaults>
</compile_context>

<pallas_src>
import jax
import jax.numpy as jnp
from jax.experimental import pallas as pl
from jax.experimental.pallas import tpu as pltpu

# ---- small, module-consistent shapes ----
N      = 2            # batch
C_IN   = 4            # in_channels (>1 so the bottleneck conv is used)
L      = 128          # sequence length (lane-aligned)
CB     = 8            # bottleneck_channels
NF     = 8            # n_filters  -> out_channels = 4 * NF
KS     = (9, 19, 39)  # kernel_sizes
C_OUT  = 4 * NF
EPS    = 1e-5         # BatchNorm1d eps

S_MAX  = max(KS) // 2          # 19: largest "same" padding -> union of shifts
NSHIFT = 2 * S_MAX + 1         # 39 shifted copies in the im2col stack
WL     = N * L                 # 256: batch packed along the lane axis
C_PAD  = 8                     # input channels zero-padded to one sublane tile
K_ROWS = NSHIFT * CB + C_PAD   # 320: contraction length of the fused matmul


def inception_kernel(x_ref, wb_ref, w_ref, gamma_ref, beta_ref, out_ref, col_ref):
    """Whole Inception block; both batch items packed along lanes."""
    x = x_ref[...]                                               # (C_PAD, WL) f32

    # lane position within each length-L sequence (shared by maxpool & im2col,
    # since C_PAD == CB == 8)
    pos = jax.lax.broadcasted_iota(jnp.int32, (C_PAD, WL), 1) % L

    # --- MaxPool1d(kernel=3, stride=1, padding=1): rolls + -inf edge masks ---
    x_l = jnp.where(pos > 0,     pltpu.roll(x, shift=1,      axis=1), -jnp.inf)
    x_r = jnp.where(pos < L - 1, pltpu.roll(x, shift=WL - 1, axis=1), -jnp.inf)
    zmp = jnp.maximum(jnp.maximum(x, x_l), x_r)                  # (C_PAD, WL)

    # --- bottleneck: Conv1d(C_IN -> CB, kernel=1, bias=False) ---
    zb = jnp.dot(wb_ref[...], x, preferred_element_type=jnp.float32)   # (CB, WL)

    # --- im2col written straight into VMEM scratch (no concat temporaries) ---
    # row (s + S_MAX)*CB + c holds zb[c, l + s] (zero outside the sequence);
    # the last C_PAD rows hold the maxpool output (fused 4th branch).
    col_ref[pl.ds(S_MAX * CB, CB), :] = zb                       # s == 0, no mask
    for s in range(1, S_MAX + 1):                                # static unroll
        fwd = pltpu.roll(zb, shift=WL - s, axis=1)               # zb[c, l + s]
        col_ref[pl.ds((S_MAX + s) * CB, CB), :] = jnp.where(pos < L - s, fwd, 0.0)
        bwd = pltpu.roll(zb, shift=s, axis=1)                    # zb[c, l - s]
        col_ref[pl.ds((S_MAX - s) * CB, CB), :] = jnp.where(pos >= s, bwd, 0.0)
    col_ref[pl.ds(NSHIFT * CB, C_PAD), :] = zmp                  # maxpool rows

    # --- all four branches as ONE MXU matmul, f32 accumulation ---
    z = jnp.dot(w_ref[...], col_ref[...],
                preferred_element_type=jnp.float32)              # (C_OUT, WL)

    # --- BatchNorm1d (training mode, biased var) folded to scale/shift + ReLU ---
    inv_n = 1.0 / WL
    mean = jnp.sum(z, axis=1, keepdims=True) * inv_n
    ex2  = jnp.sum(z * z, axis=1, keepdims=True) * inv_n
    var  = ex2 - mean * mean
    scale = gamma_ref[...] * jax.lax.rsqrt(var + EPS)
    shift = beta_ref[...] - mean * scale
    out_ref[...] = jnp.maximum(z * scale + shift, 0.0)


def _build_fused_weight(w1, w2, w3, w4):
    """Embed the three (NF, CB, K) conv weights plus the maxpool-branch 1x1 conv
    into one (C_OUT, K_ROWS) lane-dense matrix aligned to the im2col layout."""
    w_stack = jnp.zeros((C_OUT, NSHIFT, CB), jnp.float32)
    for b, w in enumerate((w1, w2, w3)):
        K = w.shape[2]
        P = K // 2
        wt = jnp.transpose(w, (0, 2, 1))                         # (NF, K, CB)
        w_stack = w_stack.at[b * NF:(b + 1) * NF,
                             S_MAX - P:S_MAX + P + 1, :].set(wt)
    w_conv = w_stack.reshape(C_OUT, NSHIFT * CB)                 # rows 24..31 zero
    w_mp = jnp.zeros((C_OUT, C_PAD), jnp.float32).at[3 * NF:, :C_IN].set(w4)
    return jnp.concatenate([w_conv, w_mp], axis=1)               # (C_OUT, K_ROWS)


@jax.jit
def inception_forward(x, wb, w1, w2, w3, w4, gamma, beta):
    # pack batch along lanes: (N, C_IN, L) -> (C_IN, N*L); pad channels to 8
    x_wide = jnp.transpose(x, (1, 0, 2)).reshape(C_IN, WL)
    x_wide = jnp.concatenate(
        [x_wide, jnp.zeros((C_PAD - C_IN, WL), jnp.float32)], axis=0)
    wb_pad = jnp.concatenate(
        [wb, jnp.zeros((CB, C_PAD - C_IN), jnp.float32)], axis=1)
    w_full = _build_fused_weight(w1, w2, w3, w4)
    gamma2 = gamma.reshape(C_OUT, 1)
    beta2 = beta.reshape(C_OUT, 1)

    vmem = lambda: pl.BlockSpec(memory_space=pltpu.MemorySpace.VMEM)
    flops = 2 * C_OUT * K_ROWS * WL + 2 * CB * C_PAD * WL        # ~5.3 MFLOP
    nbytes = 4 * (C_PAD * WL + CB * C_PAD + C_OUT * K_ROWS + 2 * C_OUT + C_OUT * WL)

    out_wide = pl.pallas_call(
        inception_kernel,
        out_shape=jax.ShapeDtypeStruct((C_OUT, WL), jnp.float32),
        in_specs=[vmem() for _ in range(5)],
        out_specs=vmem(),
        scratch_shapes=[pltpu.VMEM((K_ROWS, WL), jnp.float32)],
        cost_estimate=pl.CostEstimate(flops=flops,
                                      transcendentals=C_OUT,
                                      bytes_accessed=nbytes),
    )(x_wide, wb_pad, w_full, gamma2, beta2)

    # unpack lanes back to PyTorch NCL layout
    return jnp.transpose(out_wide.reshape(C_OUT, N, L), (1, 0, 2))


def reference_forward(x, wb, w1, w2, w3, w4, gamma, beta):
    """Pure-JAX reference mirroring the PyTorch forward (training-mode BN)."""
    dn = ('NCH', 'OIH', 'NCH')

    def conv(v, w, pad):
        return jax.lax.conv_general_dilated(v, w, (1,), [(pad, pad)],
                                            dimension_numbers=dn)

    zb = conv(x, wb[:, :, None], 0)
    zmp = jax.lax.reduce_window(x, -jnp.inf, jax.lax.max, (1, 1, 3), (1, 1, 1),
                                [(0, 0), (0, 0), (1, 1)])
    z1 = conv(zb, w1, KS[0] // 2)
    z2 = conv(zb, w2, KS[1] // 2)
    z3 = conv(zb, w3, KS[2] // 2)
    z4 = conv(zmp, w4[:, :, None], 0)
    z = jnp.concatenate([z1, z2, z3, z4], axis=1)
    mean = jnp.mean(z, axis=(0, 2), keepdims=True)
    var = jnp.mean((z - mean) ** 2, axis=(0, 2), keepdims=True)
    zn = (z - mean) * jax.lax.rsqrt(var + EPS) * gamma[None, :, None] \
        + beta[None, :, None]
    return jnp.maximum(zn, 0.0)


if __name__ == "__main__":
    key = jax.random.PRNGKey(0)
    ks = jax.random.split(key, 6)

    x  = jax.random.normal(ks[0], (N, C_IN, L), jnp.float32)
    # deterministic synthetic weights (module __init__ shapes, bias=False)
    wb = jax.random.normal(ks[1], (CB, C_IN), jnp.float32) * 0.3          # bottleneck (k=1)
    w1 = jax.random.normal(ks[2], (NF, CB, KS[0]), jnp.float32) * 0.1
    w2 = jax.random.normal(ks[3], (NF, CB, KS[1]), jnp.float32) * 0.1
    w3 = jax.random.normal(ks[4], (NF, CB, KS[2]), jnp.float32) * 0.1
    w4 = jax.random.normal(ks[5], (NF, C_IN), jnp.float32) * 0.3          # from maxpool (k=1)
    gamma = jnp.ones((C_OUT,), jnp.float32)                               # BN weight init
    beta  = jnp.zeros((C_OUT,), jnp.float32)                              # BN bias init

    out = inception_forward(x, wb, w1, w2, w3, w4, gamma, beta)
    out = jax.block_until_ready(out)

    ref = reference_forward(x, wb, w1, w2, w3, w4, gamma, beta)
    assert out.shape == (N, C_OUT, L)
    assert jnp.allclose(out, ref, atol=1e-3, rtol=1e-3), "mismatch vs JAX reference"

    print("KERNEL_OK")
</pallas_src>

<mosaic_0001>
module attributes {stable_mosaic.version = 11 : i64} {
  func.func @inception_kernel(%arg0: memref<8x256xf32, #tpu.memory_space<vmem>>, %arg1: memref<8x8xf32, #tpu.memory_space<vmem>>, %arg2: memref<32x320xf32, #tpu.memory_space<vmem>>, %arg3: memref<32x1xf32, #tpu.memory_space<vmem>>, %arg4: memref<32x1xf32, #tpu.memory_space<vmem>>, %arg5: memref<32x256xf32, #tpu.memory_space<vmem>>, %arg6: memref<320x256xf32, #tpu.memory_space<vmem>>) attributes {dimension_semantics = [], scalar_prefetch = 0 : i64, scratch_operands = 1 : i64, tpu.core_type = #tpu.core_type<tc>} {
    %c0 = arith.constant 0 : index
    %c0_0 = arith.constant 0 : index
    %0 = vector.load %arg0[%c0, %c0_0] : memref<8x256xf32, #tpu.memory_space<vmem>>, vector<8x256xf32>
    %1 = tpu.iota {dimensions = array<i32: 1>} : vector<8x256xi32>
    %c128_i32 = arith.constant 128 : i32
    %c0_i32 = arith.constant 0 : i32
    %2 = arith.cmpi eq, %c128_i32, %c0_i32 : i32
    %c1_i32 = arith.constant 1 : i32
    %3 = arith.select %2, %c1_i32, %c128_i32 : i32
    %4 = vector.broadcast %3 : i32 to vector<8x256xi32>
    %5 = arith.remsi %1, %4 : vector<8x256xi32>
    %c0_i32_1 = arith.constant 0 : i32
    %6 = vector.broadcast %c0_i32_1 : i32 to vector<8x256xi32>
    %7 = arith.cmpi ne, %5, %6 : vector<8x256xi32>
    %c0_i32_2 = arith.constant 0 : i32
    %8 = vector.broadcast %c0_i32_2 : i32 to vector<8x256xi32>
    %9 = arith.cmpi slt, %5, %8 : vector<8x256xi32>
    %c0_i32_3 = arith.constant 0 : i32
    %10 = arith.cmpi slt, %3, %c0_i32_3 : i32
    %11 = vector.broadcast %10 : i1 to vector<8x256xi1>
    %12 = vector.broadcast %11 : vector<8x256xi1> to vector<8x256xi1>
    %13 = arith.xori %9, %12 : vector<8x256xi1>
    %14 = arith.andi %13, %7 : vector<8x256xi1>
    %15 = vector.broadcast %3 : i32 to vector<8x256xi32>
    %16 = arith.addi %5, %15 : vector<8x256xi32>
    %17 = arith.select %14, %16, %5 : vector<8x256xi1>, vector<8x256xi32>
    %c0_i32_4 = arith.constant 0 : i32
    %18 = vector.broadcast %c0_i32_4 : i32 to vector<8x256xi32>
    %19 = arith.cmpi sgt, %17, %18 : vector<8x256xi32>
    %c1_i32_5 = arith.constant 1 : i32
    %20 = tpu.dynamic_rotate %0 by %c1_i32_5 dim 1 : vector<8x256xf32>, i32 -> vector<8x256xf32>
    %cst = arith.constant 0xFF800000 : f32
    %21 = vector.broadcast %cst : f32 to vector<8x256xf32>
    %22 = arith.select %19, %20, %21 : vector<8x256xi1>, vector<8x256xf32>
    %c127_i32 = arith.constant 127 : i32
    %23 = vector.broadcast %c127_i32 : i32 to vector<8x256xi32>
    %24 = arith.cmpi slt, %17, %23 : vector<8x256xi32>
    %c255_i32 = arith.constant 255 : i32
    %25 = tpu.dynamic_rotate %0 by %c255_i32 dim 1 : vector<8x256xf32>, i32 -> vector<8x256xf32>
    %cst_6 = arith.constant 0xFF800000 : f32
    %26 = vector.broadcast %cst_6 : f32 to vector<8x256xf32>
    %27 = arith.select %24, %25, %26 : vector<8x256xi1>, vector<8x256xf32>
    %28 = arith.maximumf %0, %22 : vector<8x256xf32>
    %29 = arith.maximumf %28, %27 : vector<8x256xf32>
    %c0_7 = arith.constant 0 : index
    %c0_8 = arith.constant 0 : index
    %30 = vector.load %arg1[%c0_7, %c0_8] : memref<8x8xf32, #tpu.memory_space<vmem>>, vector<8x8xf32>
    %cst_9 = arith.constant dense<0.000000e+00> : vector<8x256xf32>
    %31 = tpu.matmul %30, %0, %cst_9 {dimension_numbers = #tpu.dot_dimension_numbers<[1], [0], [0], [1], [0, 0, 1, 1], [], []>} : vector<8x8xf32>, vector<8x256xf32>, vector<8x256xf32> -> vector<8x256xf32>
    %c152 = arith.constant 152 : index
    %c0_10 = arith.constant 0 : index
    %32 = vector.load %arg6[%c152, %c0_10] : memref<320x256xf32, #tpu.memory_space<vmem>>, vector<8x256xf32>
    tpu.vector_store %arg6[%c152, %c0_10], %31 {strides = array<i32>} : memref<320x256xf32, #tpu.memory_space<vmem>>, vector<8x256xf32>,
    %c255_i32_11 = arith.constant 255 : i32
    %33 = tpu.dynamic_rotate %31 by %c255_i32_11 dim 1 : vector<8x256xf32>, i32 -> vector<8x256xf32>
    %c127_i32_12 = arith.constant 127 : i32
    %34 = vector.broadcast %c127_i32_12 : i32 to vector<8x256xi32>
    %35 = arith.cmpi slt, %17, %34 : vector<8x256xi32>
    %cst_13 = arith.constant 0.000000e+00 : f32
    %36 = vector.broadcast %cst_13 : f32 to vector<8x256xf32>
    %37 = arith.select %35, %33, %36 : vector<8x256xi1>, vector<8x256xf32>
    %c160 = arith.constant 160 : index
    %c0_14 = arith.constant 0 : index
    %38 = vector.load %arg6[%c160, %c0_14] : memref<320x256xf32, #tpu.memory_space<vmem>>, vector<8x256xf32>
    tpu.vector_store %arg6[%c160, %c0_14], %37 {strides = array<i32>} : memref<320x256xf32, #tpu.memory_space<vmem>>, vector<8x256xf32>,
    %c1_i32_15 = arith.constant 1 : i32
    %39 = tpu.dynamic_rotate %31 by %c1_i32_15 dim 1 : vector<8x256xf32>, i32 -> vector<8x256xf32>
    %c1_i32_16 = arith.constant 1 : i32
    %40 = vector.broadcast %c1_i32_16 : i32 to vector<8x256xi32>
    %41 = arith.cmpi sge, %17, %40 : vector<8x256xi32>
    %cst_17 = arith.constant 0.000000e+00 : f32
    %42 = vector.broadcast %cst_17 : f32 to vector<8x256xf32>
    %43 = arith.select %41, %39, %42 : vector<8x256xi1>, vector<8x256xf32>
    %c144 = arith.constant 144 : index
    %c0_18 = arith.constant 0 : index
    %44 = vector.load %arg6[%c144, %c0_18] : memref<320x256xf32, #tpu.memory_space<vmem>>, vector<8x256xf32>
    tpu.vector_store %arg6[%c144, %c0_18], %43 {strides = array<i32>} : memref<320x256xf32, #tpu.memory_space<vmem>>, vector<8x256xf32>,
    %c254_i32 = arith.constant 254 : i32
    %45 = tpu.dynamic_rotate %31 by %c254_i32 dim 1 : vector<8x256xf32>, i32 -> vector<8x256xf32>
    %c126_i32 = arith.constant 126 : i32
    %46 = vector.broadcast %c126_i32 : i32 to vector<8x256xi32>
    %47 = arith.cmpi slt, %17, %46 : vector<8x256xi32>
    %cst_19 = arith.constant 0.000000e+00 : f32
    %48 = vector.broadcast %cst_19 : f32 to vector<8x256xf32>
    %49 = arith.select %47, %45, %48 : vector<8x256xi1>, vector<8x256xf32>
    %c168 = arith.constant 168 : index
    %c0_20 = arith.constant 0 : index
    %50 = vector.load %arg6[%c168, %c0_20] : memref<320x256xf32, #tpu.memory_space<vmem>>, vector<8x256xf32>
    tpu.vector_store %arg6[%c168, %c0_20], %49 {strides = array<i32>} : memref<320x256xf32, #tpu.memory_space<vmem>>, vector<8x256xf32>,
    %c2_i32 = arith.constant 2 : i32
    %51 = tpu.dynamic_rotate %31 by %c2_i32 dim 1 : vector<8x256xf32>, i32 -> vector<8x256xf32>
    %c2_i32_21 = arith.constant 2 : i32
    %52 = vector.broadcast %c2_i32_21 : i32 to vector<8x256xi32>
    %53 = arith.cmpi sge, %17, %52 : vector<8x256xi32>
    %cst_22 = arith.constant 0.000000e+00 : f32
    %54 = vector.broadcast %cst_22 : f32 to vector<8x256xf32>
    %55 = arith.select %53, %51, %54 : vector<8x256xi1>, vector<8x256xf32>
    %c136 = arith.constant 136 : index
    %c0_23 = arith.constant 0 : index
    %56 = vector.load %arg6[%c136, %c0_23] : memref<320x256xf32, #tpu.memory_space<vmem>>, vector<8x256xf32>
    tpu.vector_store %arg6[%c136, %c0_23], %55 {strides = array<i32>} : memref<320x256xf32, #tpu.memory_space<vmem>>, vector<8x256xf32>,
    %c253_i32 = arith.constant 253 : i32
    %57 = tpu.dynamic_rotate %31 by %c253_i32 dim 1 : vector<8x256xf32>, i32 -> vector<8x256xf32>
    %c125_i32 = arith.constant 125 : i32
    %58 = vector.broadcast %c125_i32 : i32 to vector<8x256xi32>
    %59 = arith.cmpi slt, %17, %58 : vector<8x256xi32>
    %cst_24 = arith.constant 0.000000e+00 : f32
    %60 = vector.broadcast %cst_24 : f32 to vector<8x256xf32>
    %61 = arith.select %59, %57, %60 : vector<8x256xi1>, vector<8x256xf32>
    %c176 = arith.constant 176 : index
    %c0_25 = arith.constant 0 : index
    %62 = vector.load %arg6[%c176, %c0_25] : memref<320x256xf32, #tpu.memory_space<vmem>>, vector<8x256xf32>
    tpu.vector_store %arg6[%c176, %c0_25], %61 {strides = array<i32>} : memref<320x256xf32, #tpu.memory_space<vmem>>, vector<8x256xf32>,
    %c3_i32 = arith.constant 3 : i32
    %63 = tpu.dynamic_rotate %31 by %c3_i32 dim 1 : vector<8x256xf32>, i32 -> vector<8x256xf32>
    %c3_i32_26 = arith.constant 3 : i32
    %64 = vector.broadcast %c3_i32_26 : i32 to vector<8x256xi32>
    %65 = arith.cmpi sge, %17, %64 : vector<8x256xi32>
    %cst_27 = arith.constant 0.000000e+00 : f32
    %66 = vector.broadcast %cst_27 : f32 to vector<8x256xf32>
    %67 = arith.select %65, %63, %66 : vector<8x256xi1>, vector<8x256xf32>
    %c128 = arith.constant 128 : index
    %c0_28 = arith.constant 0 : index
    %68 = vector.load %arg6[%c128, %c0_28] : memref<320x256xf32, #tpu.memory_space<vmem>>, vector<8x256xf32>
    tpu.vector_store %arg6[%c128, %c0_28], %67 {strides = array<i32>} : memref<320x256xf32, #tpu.memory_space<vmem>>, vector<8x256xf32>,
    %c252_i32 = arith.constant 252 : i32
    %69 = tpu.dynamic_rotate %31 by %c252_i32 dim 1 : vector<8x256xf32>, i32 -> vector<8x256xf32>
    %c124_i32 = arith.constant 124 : i32
    %70 = vector.broadcast %c124_i32 : i32 to vector<8x256xi32>
    %71 = arith.cmpi slt, %17, %70 : vector<8x256xi32>
    %cst_29 = arith.constant 0.000000e+00 : f32
    %72 = vector.broadcast %cst_29 : f32 to vector<8x256xf32>
    %73 = arith.select %71, %69, %72 : vector<8x256xi1>, vector<8x256xf32>
    %c184 = arith.constant 184 : index
    %c0_30 = arith.constant 0 : index
    %74 = vector.load %arg6[%c184, %c0_30] : memref<320x256xf32, #tpu.memory_space<vmem>>, vector<8x256xf32>
    tpu.vector_store %arg6[%c184, %c0_30], %73 {strides = array<i32>} : memref<320x256xf32, #tpu.memory_space<vmem>>, vector<8x256xf32>,
    %c4_i32 = arith.constant 4 : i32
    %75 = tpu.dynamic_rotate %31 by %c4_i32 dim 1 : vector<8x256xf32>, i32 -> vector<8x256xf32>
    %c4_i32_31 = arith.constant 4 : i32
    %76 = vector.broadcast %c4_i32_31 : i32 to vector<8x256xi32>
    %77 = arith.cmpi sge, %17, %76 : vector<8x256xi32>
    %cst_32 = arith.constant 0.000000e+00 : f32
    %78 = vector.broadcast %cst_32 : f32 to vector<8x256xf32>
    %79 = arith.select %77, %75, %78 : vector<8x256xi1>, vector<8x256xf32>
    %c120 = arith.constant 120 : index
    %c0_33 = arith.constant 0 : index
    %80 = vector.load %arg6[%c120, %c0_33] : memref<320x256xf32, #tpu.memory_space<vmem>>, vector<8x256xf32>
    tpu.vector_store %arg6[%c120, %c0_33], %79 {strides = array<i32>} : memref<320x256xf32, #tpu.memory_space<vmem>>, vector<8x256xf32>,
    %c251_i32 = arith.constant 251 : i32
    %81 = tpu.dynamic_rotate %31 by %c251_i32 dim 1 : vector<8x256xf32>, i32 -> vector<8x256xf32>
    %c123_i32 = arith.constant 123 : i32
    %82 = vector.broadcast %c123_i32 : i32 to vector<8x256xi32>
    %83 = arith.cmpi slt, %17, %82 : vector<8x256xi32>
    %cst_34 = arith.constant 0.000000e+00 : f32
    %84 = vector.broadcast %cst_34 : f32 to vector<8x256xf32>
    %85 = arith.select %83, %81, %84 : vector<8x256xi1>, vector<8x256xf32>
    %c192 = arith.constant 192 : index
    %c0_35 = arith.constant 0 : index
    %86 = vector.load %arg6[%c192, %c0_35] : memref<320x256xf32, #tpu.memory_space<vmem>>, vector<8x256xf32>
    tpu.vector_store %arg6[%c192, %c0_35], %85 {strides = array<i32>} : memref<320x256xf32, #tpu.memory_space<vmem>>, vector<8x256xf32>,
    %c5_i32 = arith.constant 5 : i32
    %87 = tpu.dynamic_rotate %31 by %c5_i32 dim 1 : vector<8x256xf32>, i32 -> vector<8x256xf32>
    %c5_i32_36 = arith.constant 5 : i32
    %88 = vector.broadcast %c5_i32_36 : i32 to vector<8x256xi32>
    %89 = arith.cmpi sge, %17, %88 : vector<8x256xi32>
    %cst_37 = arith.constant 0.000000e+00 : f32
    %90 = vector.broadcast %cst_37 : f32 to vector<8x256xf32>
    %91 = arith.select %89, %87, %90 : vector<8x256xi1>, vector<8x256xf32>
    %c112 = arith.constant 112 : index
    %c0_38 = arith.constant 0 : index
    %92 = vector.load %arg6[%c112, %c0_38] : memref<320x256xf32, #tpu.memory_space<vmem>>, vector<8x256xf32>
    tpu.vector_store %arg6[%c112, %c0_38], %91 {strides = array<i32>} : memref<320x256xf32, #tpu.memory_space<vmem>>, vector<8x256xf32>,
    %c250_i32 = arith.constant 250 : i32
    %93 = tpu.dynamic_rotate %31 by %c250_i32 dim 1 : vector<8x256xf32>, i32 -> vector<8x256xf32>
    %c122_i32 = arith.constant 122 : i32
    %94 = vector.broadcast %c122_i32 : i32 to vector<8x256xi32>
    %95 = arith.cmpi slt, %17, %94 : vector<8x256xi32>
    %cst_39 = arith.constant 0.000000e+00 : f32
    %96 = vector.broadcast %cst_39 : f32 to vector<8x256xf32>
    %97 = arith.select %95, %93, %96 : vector<8x256xi1>, vector<8x256xf32>
    %c200 = arith.constant 200 : index
    %c0_40 = arith.constant 0 : index
    %98 = vector.load %arg6[%c200, %c0_40] : memref<320x256xf32, #tpu.memory_space<vmem>>, vector<8x256xf32>
    tpu.vector_store %arg6[%c200, %c0_40], %97 {strides = array<i32>} : memref<320x256xf32, #tpu.memory_space<vmem>>, vector<8x256xf32>,
    %c6_i32 = arith.constant 6 : i32
    %99 = tpu.dynamic_rotate %31 by %c6_i32 dim 1 : vector<8x256xf32>, i32 -> vector<8x256xf32>
    %c6_i32_41 = arith.constant 6 : i32
    %100 = vector.broadcast %c6_i32_41 : i32 to vector<8x256xi32>
    %101 = arith.cmpi sge, %17, %100 : vector<8x256xi32>
    %cst_42 = arith.constant 0.000000e+00 : f32
    %102 = vector.broadcast %cst_42 : f32 to vector<8x256xf32>
    %103 = arith.select %101, %99, %102 : vector<8x256xi1>, vector<8x256xf32>
    %c104 = arith.constant 104 : index
    %c0_43 = arith.constant 0 : index
    %104 = vector.load %arg6[%c104, %c0_43] : memref<320x256xf32, #tpu.memory_space<vmem>>, vector<8x256xf32>
    tpu.vector_store %arg6[%c104, %c0_43], %103 {strides = array<i32>} : memref<320x256xf32, #tpu.memory_space<vmem>>, vector<8x256xf32>,
    %c249_i32 = arith.constant 249 : i32
    %105 = tpu.dynamic_rotate %31 by %c249_i32 dim 1 : vector<8x256xf32>, i32 -> vector<8x256xf32>
    %c121_i32 = arith.constant 121 : i32
    %106 = vector.broadcast %c121_i32 : i32 to vector<8x256xi32>
    %107 = arith.cmpi slt, %17, %106 : vector<8x256xi32>
    %cst_44 = arith.constant 0.000000e+00 : f32
    %108 = vector.broadcast %cst_44 : f32 to vector<8x256xf32>
    %109 = arith.select %107, %105, %108 : vector<8x256xi1>, vector<8x256xf32>
    %c208 = arith.constant 208 : index
    %c0_45 = arith.constant 0 : index
    %110 = vector.load %arg6[%c208, %c0_45] : memref<320x256xf32, #tpu.memory_space<vmem>>, vector<8x256xf32>
    tpu.vector_store %arg6[%c208, %c0_45], %109 {strides = array<i32>} : memref<320x256xf32, #tpu.memory_space<vmem>>, vector<8x256xf32>,
    %c7_i32 = arith.constant 7 : i32
    %111 = tpu.dynamic_rotate %31 by %c7_i32 dim 1 : vector<8x256xf32>, i32 -> vector<8x256xf32>
    %c7_i32_46 = arith.constant 7 : i32
    %112 = vector.broadcast %c7_i32_46 : i32 to vector<8x256xi32>
    %113 = arith.cmpi sge, %17, %112 : vector<8x256xi32>
    %cst_47 = arith.constant 0.000000e+00 : f32
    %114 = vector.broadcast %cst_47 : f32 to vector<8x256xf32>
    %115 = arith.select %113, %111, %114 : vector<8x256xi1>, vector<8x256xf32>
    %c96 = arith.constant 96 : index
    %c0_48 = arith.constant 0 : index
    %116 = vector.load %arg6[%c96, %c0_48] : memref<320x256xf32, #tpu.memory_space<vmem>>, vector<8x256xf32>
    tpu.vector_store %arg6[%c96, %c0_48], %115 {strides = array<i32>} : memref<320x256xf32, #tpu.memory_space<vmem>>, vector<8x256xf32>,
    %c248_i32 = arith.constant 248 : i32
    %117 = tpu.dynamic_rotate %31 by %c248_i32 dim 1 : vector<8x256xf32>, i32 -> vector<8x256xf32>
    %c120_i32 = arith.constant 120 : i32
    %118 = vector.broadcast %c120_i32 : i32 to vector<8x256xi32>
    %119 = arith.cmpi slt, %17, %118 : vector<8x256xi32>
    %cst_49 = arith.constant 0.000000e+00 : f32
    %120 = vector.broadcast %cst_49 : f32 to vector<8x256xf32>
    %121 = arith.select %119, %117, %120 : vector<8x256xi1>, vector<8x256xf32>
    %c216 = arith.constant 216 : index
    %c0_50 = arith.constant 0 : index
    %122 = vector.load %arg6[%c216, %c0_50] : memref<320x256xf32, #tpu.memory_space<vmem>>, vector<8x256xf32>
    tpu.vector_store %arg6[%c216, %c0_50], %121 {strides = array<i32>} : memref<320x256xf32, #tpu.memory_space<vmem>>, vector<8x256xf32>,
    %c8_i32 = arith.constant 8 : i32
    %123 = tpu.dynamic_rotate %31 by %c8_i32 dim 1 : vector<8x256xf32>, i32 -> vector<8x256xf32>
    %c8_i32_51 = arith.constant 8 : i32
    %124 = vector.broadcast %c8_i32_51 : i32 to vector<8x256xi32>
    %125 = arith.cmpi sge, %17, %124 : vector<8x256xi32>
    %cst_52 = arith.constant 0.000000e+00 : f32
    %126 = vector.broadcast %cst_52 : f32 to vector<8x256xf32>
    %127 = arith.select %125, %123, %126 : vector<8x256xi1>, vector<8x256xf32>
    %c88 = arith.constant 88 : index
    %c0_53 = arith.constant 0 : index
    %128 = vector.load %arg6[%c88, %c0_53] : memref<320x256xf32, #tpu.memory_space<vmem>>, vector<8x256xf32>
    tpu.vector_store %arg6[%c88, %c0_53], %127 {strides = array<i32>} : memref<320x256xf32, #tpu.memory_space<vmem>>, vector<8x256xf32>,
    %c247_i32 = arith.constant 247 : i32
    %129 = tpu.dynamic_rotate %31 by %c247_i32 dim 1 : vector<8x256xf32>, i32 -> vector<8x256xf32>
    %c119_i32 = arith.constant 119 : i32
    %130 = vector.broadcast %c119_i32 : i32 to vector<8x256xi32>
    %131 = arith.cmpi slt, %17, %130 : vector<8x256xi32>
    %cst_54 = arith.constant 0.000000e+00 : f32
    %132 = vector.broadcast %cst_54 : f32 to vector<8x256xf32>
    %133 = arith.select %131, %129, %132 : vector<8x256xi1>, vector<8x256xf32>
    %c224 = arith.constant 224 : index
    %c0_55 = arith.constant 0 : index
    %134 = vector.load %arg6[%c224, %c0_55] : memref<320x256xf32, #tpu.memory_space<vmem>>, vector<8x256xf32>
    tpu.vector_store %arg6[%c224, %c0_55], %133 {strides = array<i32>} : memref<320x256xf32, #tpu.memory_space<vmem>>, vector<8x256xf32>,
    %c9_i32 = arith.constant 9 : i32
    %135 = tpu.dynamic_rotate %31 by %c9_i32 dim 1 : vector<8x256xf32>, i32 -> vector<8x256xf32>
    %c9_i32_56 = arith.constant 9 : i32
    %136 = vector.broadcast %c9_i32_56 : i32 to vector<8x256xi32>
    %137 = arith.cmpi sge, %17, %136 : vector<8x256xi32>
    %cst_57 = arith.constant 0.000000e+00 : f32
    %138 = vector.broadcast %cst_57 : f32 to vector<8x256xf32>
    %139 = arith.select %137, %135, %138 : vector<8x256xi1>, vector<8x256xf32>
    %c80 = arith.constant 80 : index
    %c0_58 = arith.constant 0 : index
    %140 = vector.load %arg6[%c80, %c0_58] : memref<320x256xf32, #tpu.memory_space<vmem>>, vector<8x256xf32>
    tpu.vector_store %arg6[%c80, %c0_58], %139 {strides = array<i32>} : memref<320x256xf32, #tpu.memory_space<vmem>>, vector<8x256xf32>,
    %c246_i32 = arith.constant 246 : i32
    %141 = tpu.dynamic_rotate %31 by %c246_i32 dim 1 : vector<8x256xf32>, i32 -> vector<8x256xf32>
    %c118_i32 = arith.constant 118 : i32
    %142 = vector.broadcast %c118_i32 : i32 to vector<8x256xi32>
    %143 = arith.cmpi slt, %17, %142 : vector<8x256xi32>
    %cst_59 = arith.constant 0.000000e+00 : f32
    %144 = vector.broadcast %cst_59 : f32 to vector<8x256xf32>
    %145 = arith.select %143, %141, %144 : vector<8x256xi1>, vector<8x256xf32>
    %c232 = arith.constant 232 : index
    %c0_60 = arith.constant 0 : index
    %146 = vector.load %arg6[%c232, %c0_60] : memref<320x256xf32, #tpu.memory_space<vmem>>, vector<8x256xf32>
    tpu.vector_store %arg6[%c232, %c0_60], %145 {strides = array<i32>} : memref<320x256xf32, #tpu.memory_space<vmem>>, vector<8x256xf32>,
    %c10_i32 = arith.constant 10 : i32
    %147 = tpu.dynamic_rotate %31 by %c10_i32 dim 1 : vector<8x256xf32>, i32 -> vector<8x256xf32>
    %c10_i32_61 = arith.constant 10 : i32
    %148 = vector.broadcast %c10_i32_61 : i32 to vector<8x256xi32>
    %149 = arith.cmpi sge, %17, %148 : vector<8x256xi32>
    %cst_62 = arith.constant 0.000000e+00 : f32
    %150 = vector.broadcast %cst_62 : f32 to vector<8x256xf32>
    %151 = arith.select %149, %147, %150 : vector<8x256xi1>, vector<8x256xf32>
    %c72 = arith.constant 72 : index
    %c0_63 = arith.constant 0 : index
    %152 = vector.load %arg6[%c72, %c0_63] : memref<320x256xf32, #tpu.memory_space<vmem>>, vector<8x256xf32>
    tpu.vector_store %arg6[%c72, %c0_63], %151 {strides = array<i32>} : memref<320x256xf32, #tpu.memory_space<vmem>>, vector<8x256xf32>,
    %c245_i32 = arith.constant 245 : i32
    %153 = tpu.dynamic_rotate %31 by %c245_i32 dim 1 : vector<8x256xf32>, i32 -> vector<8x256xf32>
    %c117_i32 = arith.constant 117 : i32
    %154 = vector.broadcast %c117_i32 : i32 to vector<8x256xi32>
    %155 = arith.cmpi slt, %17, %154 : vector<8x256xi32>
    %cst_64 = arith.constant 0.000000e+00 : f32
    %156 = vector.broadcast %cst_64 : f32 to vector<8x256xf32>
    %157 = arith.select %155, %153, %156 : vector<8x256xi1>, vector<8x256xf32>
    %c240 = arith.constant 240 : index
    %c0_65 = arith.constant 0 : index
    %158 = vector.load %arg6[%c240, %c0_65] : memref<320x256xf32, #tpu.memory_space<vmem>>, vector<8x256xf32>
    tpu.vector_store %arg6[%c240, %c0_65], %157 {strides = array<i32>} : memref<320x256xf32, #tpu.memory_space<vmem>>, vector<8x256xf32>,
    %c11_i32 = arith.constant 11 : i32
    %159 = tpu.dynamic_rotate %31 by %c11_i32 dim 1 : vector<8x256xf32>, i32 -> vector<8x256xf32>
    %c11_i32_66 = arith.constant 11 : i32
    %160 = vector.broadcast %c11_i32_66 : i32 to vector<8x256xi32>
    %161 = arith.cmpi sge, %17, %160 : vector<8x256xi32>
    %cst_67 = arith.constant 0.000000e+00 : f32
    %162 = vector.broadcast %cst_67 : f32 to vector<8x256xf32>
    %163 = arith.select %161, %159, %162 : vector<8x256xi1>, vector<8x256xf32>
    %c64 = arith.constant 64 : index
    %c0_68 = arith.constant 0 : index
    %164 = vector.load %arg6[%c64, %c0_68] : memref<320x256xf32, #tpu.memory_space<vmem>>, vector<8x256xf32>
    tpu.vector_store %arg6[%c64, %c0_68], %163 {strides = array<i32>} : memref<320x256xf32, #tpu.memory_space<vmem>>, vector<8x256xf32>,
    %c244_i32 = arith.constant 244 : i32
    %165 = tpu.dynamic_rotate %31 by %c244_i32 dim 1 : vector<8x256xf32>, i32 -> vector<8x256xf32>
    %c116_i32 = arith.constant 116 : i32
    %166 = vector.broadcast %c116_i32 : i32 to vector<8x256xi32>
    %167 = arith.cmpi slt, %17, %166 : vector<8x256xi32>
    %cst_69 = arith.constant 0.000000e+00 : f32
    %168 = vector.broadcast %cst_69 : f32 to vector<8x256xf32>
    %169 = arith.select %167, %165, %168 : vector<8x256xi1>, vector<8x256xf32>
    %c248 = arith.constant 248 : index
    %c0_70 = arith.constant 0 : index
    %170 = vector.load %arg6[%c248, %c0_70] : memref<320x256xf32, #tpu.memory_space<vmem>>, vector<8x256xf32>
    tpu.vector_store %arg6[%c248, %c0_70], %169 {strides = array<i32>} : memref<320x256xf32, #tpu.memory_space<vmem>>, vector<8x256xf32>,
    %c12_i32 = arith.constant 12 : i32
    %171 = tpu.dynamic_rotate %31 by %c12_i32 dim 1 : vector<8x256xf32>, i32 -> vector<8x256xf32>
    %c12_i32_71 = arith.constant 12 : i32
    %172 = vector.broadcast %c12_i32_71 : i32 to vector<8x256xi32>
    %173 = arith.cmpi sge, %17, %172 : vector<8x256xi32>
    %cst_72 = arith.constant 0.000000e+00 : f32
    %174 = vector.broadcast %cst_72 : f32 to vector<8x256xf32>
    %175 = arith.select %173, %171, %174 : vector<8x256xi1>, vector<8x256xf32>
    %c56 = arith.constant 56 : index
    %c0_73 = arith.constant 0 : index
    %176 = vector.load %arg6[%c56, %c0_73] : memref<320x256xf32, #tpu.memory_space<vmem>>, vector<8x256xf32>
    tpu.vector_store %arg6[%c56, %c0_73], %175 {strides = array<i32>} : memref<320x256xf32, #tpu.memory_space<vmem>>, vector<8x256xf32>,
    %c243_i32 = arith.constant 243 : i32
    %177 = tpu.dynamic_rotate %31 by %c243_i32 dim 1 : vector<8x256xf32>, i32 -> vector<8x256xf32>
    %c115_i32 = arith.constant 115 : i32
    %178 = vector.broadcast %c115_i32 : i32 to vector<8x256xi32>
    %179 = arith.cmpi slt, %17, %178 : vector<8x256xi32>
    %cst_74 = arith.constant 0.000000e+00 : f32
    %180 = vector.broadcast %cst_74 : f32 to vector<8x256xf32>
    %181 = arith.select %179, %177, %180 : vector<8x256xi1>, vector<8x256xf32>
    %c256 = arith.constant 256 : index
    %c0_75 = arith.constant 0 : index
    %182 = vector.load %arg6[%c256, %c0_75] : memref<320x256xf32, #tpu.memory_space<vmem>>, vector<8x256xf32>
    tpu.vector_store %arg6[%c256, %c0_75], %181 {strides = array<i32>} : memref<320x256xf32, #tpu.memory_space<vmem>>, vector<8x256xf32>,
    %c13_i32 = arith.constant 13 : i32
    %183 = tpu.dynamic_rotate %31 by %c13_i32 dim 1 : vector<8x256xf32>, i32 -> vector<8x256xf32>
    %c13_i32_76 = arith.constant 13 : i32
    %184 = vector.broadcast %c13_i32_76 : i32 to vector<8x256xi32>
    %185 = arith.cmpi sge, %17, %184 : vector<8x256xi32>
    %cst_77 = arith.constant 0.000000e+00 : f32
    %186 = vector.broadcast %cst_77 : f32 to vector<8x256xf32>
    %187 = arith.select %185, %183, %186 : vector<8x256xi1>, vector<8x256xf32>
    %c48 = arith.constant 48 : index
    %c0_78 = arith.constant 0 : index
    %188 = vector.load %arg6[%c48, %c0_78] : memref<320x256xf32, #tpu.memory_space<vmem>>, vector<8x256xf32>
    tpu.vector_store %arg6[%c48, %c0_78], %187 {strides = array<i32>} : memref<320x256xf32, #tpu.memory_space<vmem>>, vector<8x256xf32>,
    %c242_i32 = arith.constant 242 : i32
    %189 = tpu.dynamic_rotate %31 by %c242_i32 dim 1 : vector<8x256xf32>, i32 -> vector<8x256xf32>
    %c114_i32 = arith.constant 114 : i32
    %190 = vector.broadcast %c114_i32 : i32 to vector<8x256xi32>
    %191 = arith.cmpi slt, %17, %190 : vector<8x256xi32>
    %cst_79 = arith.constant 0.000000e+00 : f32
    %192 = vector.broadcast %cst_79 : f32 to vector<8x256xf32>
    %193 = arith.select %191, %189, %192 : vector<8x256xi1>, vector<8x256xf32>
    %c264 = arith.constant 264 : index
    %c0_80 = arith.constant 0 : index
    %194 = vector.load %arg6[%c264, %c0_80] : memref<320x256xf32, #tpu.memory_space<vmem>>, vector<8x256xf32>
    tpu.vector_store %arg6[%c264, %c0_80], %193 {strides = array<i32>} : memref<320x256xf32, #tpu.memory_space<vmem>>, vector<8x256xf32>,
    %c14_i32 = arith.constant 14 : i32
    %195 = tpu.dynamic_rotate %31 by %c14_i32 dim 1 : vector<8x256xf32>, i32 -> vector<8x256xf32>
    %c14_i32_81 = arith.constant 14 : i32
    %196 = vector.broadcast %c14_i32_81 : i32 to vector<8x256xi32>
    %197 = arith.cmpi sge, %17, %196 : vector<8x256xi32>
    %cst_82 = arith.constant 0.000000e+00 : f32
    %198 = vector.broadcast %cst_82 : f32 to vector<8x256xf32>
    %199 = arith.select %197, %195, %198 : vector<8x256xi1>, vector<8x256xf32>
    %c40 = arith.constant 40 : index
    %c0_83 = arith.constant 0 : index
    %200 = vector.load %arg6[%c40, %c0_83] : memref<320x256xf32, #tpu.memory_space<vmem>>, vector<8x256xf32>
    tpu.vector_store %arg6[%c40, %c0_83], %199 {strides = array<i32>} : memref<320x256xf32, #tpu.memory_space<vmem>>, vector<8x256xf32>,
    %c241_i32 = arith.constant 241 : i32
    %201 = tpu.dynamic_rotate %31 by %c241_i32 dim 1 : vector<8x256xf32>, i32 -> vector<8x256xf32>
    %c113_i32 = arith.constant 113 : i32
    %202 = vector.broadcast %c113_i32 : i32 to vector<8x256xi32>
    %203 = arith.cmpi slt, %17, %202 : vector<8x256xi32>
    %cst_84 = arith.constant 0.000000e+00 : f32
    %204 = vector.broadcast %cst_84 : f32 to vector<8x256xf32>
    %205 = arith.select %203, %201, %204 : vector<8x256xi1>, vector<8x256xf32>
    %c272 = arith.constant 272 : index
    %c0_85 = arith.constant 0 : index
    %206 = vector.load %arg6[%c272, %c0_85] : memref<320x256xf32, #tpu.memory_space<vmem>>, vector<8x256xf32>
    tpu.vector_store %arg6[%c272, %c0_85], %205 {strides = array<i32>} : memref<320x256xf32, #tpu.memory_space<vmem>>, vector<8x256xf32>,
    %c15_i32 = arith.constant 15 : i32
    %207 = tpu.dynamic_rotate %31 by %c15_i32 dim 1 : vector<8x256xf32>, i32 -> vector<8x256xf32>
    %c15_i32_86 = arith.constant 15 : i32
    %208 = vector.broadcast %c15_i32_86 : i32 to vector<8x256xi32>
    %209 = arith.cmpi sge, %17, %208 : vector<8x256xi32>
    %cst_87 = arith.constant 0.000000e+00 : f32
    %210 = vector.broadcast %cst_87 : f32 to vector<8x256xf32>
    %211 = arith.select %209, %207, %210 : vector<8x256xi1>, vector<8x256xf32>
    %c32 = arith.constant 32 : index
    %c0_88 = arith.constant 0 : index
    %212 = vector.load %arg6[%c32, %c0_88] : memref<320x256xf32, #tpu.memory_space<vmem>>, vector<8x256xf32>
    tpu.vector_store %arg6[%c32, %c0_88], %211 {strides = array<i32>} : memref<320x256xf32, #tpu.memory_space<vmem>>, vector<8x256xf32>,
    %c240_i32 = arith.constant 240 : i32
    %213 = tpu.dynamic_rotate %31 by %c240_i32 dim 1 : vector<8x256xf32>, i32 -> vector<8x256xf32>
    %c112_i32 = arith.constant 112 : i32
    %214 = vector.broadcast %c112_i32 : i32 to vector<8x256xi32>
    %215 = arith.cmpi slt, %17, %214 : vector<8x256xi32>
    %cst_89 = arith.constant 0.000000e+00 : f32
    %216 = vector.broadcast %cst_89 : f32 to vector<8x256xf32>
    %217 = arith.select %215, %213, %216 : vector<8x256xi1>, vector<8x256xf32>
    %c280 = arith.constant 280 : index
    %c0_90 = arith.constant 0 : index
    %218 = vector.load %arg6[%c280, %c0_90] : memref<320x256xf32, #tpu.memory_space<vmem>>, vector<8x256xf32>
    tpu.vector_store %arg6[%c280, %c0_90], %217 {strides = array<i32>} : memref<320x256xf32, #tpu.memory_space<vmem>>, vector<8x256xf32>,
    %c16_i32 = arith.constant 16 : i32
    %219 = tpu.dynamic_rotate %31 by %c16_i32 dim 1 : vector<8x256xf32>, i32 -> vector<8x256xf32>
    %c16_i32_91 = arith.constant 16 : i32
    %220 = vector.broadcast %c16_i32_91 : i32 to vector<8x256xi32>
    %221 = arith.cmpi sge, %17, %220 : vector<8x256xi32>
    %cst_92 = arith.constant 0.000000e+00 : f32
    %222 = vector.broadcast %cst_92 : f32 to vector<8x256xf32>
    %223 = arith.select %221, %219, %222 : vector<8x256xi1>, vector<8x256xf32>
    %c24 = arith.constant 24 : index
    %c0_93 = arith.constant 0 : index
    %224 = vector.load %arg6[%c24, %c0_93] : memref<320x256xf32, #tpu.memory_space<vmem>>, vector<8x256xf32>
    tpu.vector_store %arg6[%c24, %c0_93], %223 {strides = array<i32>} : memref<320x256xf32, #tpu.memory_space<vmem>>, vector<8x256xf32>,
    %c239_i32 = arith.constant 239 : i32
    %225 = tpu.dynamic_rotate %31 by %c239_i32 dim 1 : vector<8x256xf32>, i32 -> vector<8x256xf32>
    %c111_i32 = arith.constant 111 : i32
    %226 = vector.broadcast %c111_i32 : i32 to vector<8x256xi32>
    %227 = arith.cmpi slt, %17, %226 : vector<8x256xi32>
    %cst_94 = arith.constant 0.000000e+00 : f32
    %228 = vector.broadcast %cst_94 : f32 to vector<8x256xf32>
    %229 = arith.select %227, %225, %228 : vector<8x256xi1>, vector<8x256xf32>
    %c288 = arith.constant 288 : index
    %c0_95 = arith.constant 0 : index
    %230 = vector.load %arg6[%c288, %c0_95] : memref<320x256xf32, #tpu.memory_space<vmem>>, vector<8x256xf32>
    tpu.vector_store %arg6[%c288, %c0_95], %229 {strides = array<i32>} : memref<320x256xf32, #tpu.memory_space<vmem>>, vector<8x256xf32>,
    %c17_i32 = arith.constant 17 : i32
    %231 = tpu.dynamic_rotate %31 by %c17_i32 dim 1 : vector<8x256xf32>, i32 -> vector<8x256xf32>
    %c17_i32_96 = arith.constant 17 : i32
    %232 = vector.broadcast %c17_i32_96 : i32 to vector<8x256xi32>
    %233 = arith.cmpi sge, %17, %232 : vector<8x256xi32>
    %cst_97 = arith.constant 0.000000e+00 : f32
    %234 = vector.broadcast %cst_97 : f32 to vector<8x256xf32>
    %235 = arith.select %233, %231, %234 : vector<8x256xi1>, vector<8x256xf32>
    %c16 = arith.constant 16 : index
    %c0_98 = arith.constant 0 : index
    %236 = vector.load %arg6[%c16, %c0_98] : memref<320x256xf32, #tpu.memory_space<vmem>>, vector<8x256xf32>
    tpu.vector_store %arg6[%c16, %c0_98], %235 {strides = array<i32>} : memref<320x256xf32, #tpu.memory_space<vmem>>, vector<8x256xf32>,
    %c238_i32 = arith.constant 238 : i32
    %237 = tpu.dynamic_rotate %31 by %c238_i32 dim 1 : vector<8x256xf32>, i32 -> vector<8x256xf32>
    %c110_i32 = arith.constant 110 : i32
    %238 = vector.broadcast %c110_i32 : i32 to vector<8x256xi32>
    %239 = arith.cmpi slt, %17, %238 : vector<8x256xi32>
    %cst_99 = arith.constant 0.000000e+00 : f32
    %240 = vector.broadcast %cst_99 : f32 to vector<8x256xf32>
    %241 = arith.select %239, %237, %240 : vector<8x256xi1>, vector<8x256xf32>
    %c296 = arith.constant 296 : index
    %c0_100 = arith.constant 0 : index
    %242 = vector.load %arg6[%c296, %c0_100] : memref<320x256xf32, #tpu.memory_space<vmem>>, vector<8x256xf32>
    tpu.vector_store %arg6[%c296, %c0_100], %241 {strides = array<i32>} : memref<320x256xf32, #tpu.memory_space<vmem>>, vector<8x256xf32>,
    %c18_i32 = arith.constant 18 : i32
    %243 = tpu.dynamic_rotate %31 by %c18_i32 dim 1 : vector<8x256xf32>, i32 -> vector<8x256xf32>
    %c18_i32_101 = arith.constant 18 : i32
    %244 = vector.broadcast %c18_i32_101 : i32 to vector<8x256xi32>
    %245 = arith.cmpi sge, %17, %244 : vector<8x256xi32>
    %cst_102 = arith.constant 0.000000e+00 : f32
    %246 = vector.broadcast %cst_102 : f32 to vector<8x256xf32>
    %247 = arith.select %245, %243, %246 : vector<8x256xi1>, vector<8x256xf32>
    %c8 = arith.constant 8 : index
    %c0_103 = arith.constant 0 : index
    %248 = vector.load %arg6[%c8, %c0_103] : memref<320x256xf32, #tpu.memory_space<vmem>>, vector<8x256xf32>
    tpu.vector_store %arg6[%c8, %c0_103], %247 {strides = array<i32>} : memref<320x256xf32, #tpu.memory_space<vmem>>, vector<8x256xf32>,
    %c237_i32 = arith.constant 237 : i32
    %249 = tpu.dynamic_rotate %31 by %c237_i32 dim 1 : vector<8x256xf32>, i32 -> vector<8x256xf32>
    %c109_i32 = arith.constant 109 : i32
    %250 = vector.broadcast %c109_i32 : i32 to vector<8x256xi32>
    %251 = arith.cmpi slt, %17, %250 : vector<8x256xi32>
    %cst_104 = arith.constant 0.000000e+00 : f32
    %252 = vector.broadcast %cst_104 : f32 to vector<8x256xf32>
    %253 = arith.select %251, %249, %252 : vector<8x256xi1>, vector<8x256xf32>
    %c304 = arith.constant 304 : index
    %c0_105 = arith.constant 0 : index
    %254 = vector.load %arg6[%c304, %c0_105] : memref<320x256xf32, #tpu.memory_space<vmem>>, vector<8x256xf32>
    tpu.vector_store %arg6[%c304, %c0_105], %253 {strides = array<i32>} : memref<320x256xf32, #tpu.memory_space<vmem>>, vector<8x256xf32>,
    %c19_i32 = arith.constant 19 : i32
    %255 = tpu.dynamic_rotate %31 by %c19_i32 dim 1 : vector<8x256xf32>, i32 -> vector<8x256xf32>
    %c19_i32_106 = arith.constant 19 : i32
    %256 = vector.broadcast %c19_i32_106 : i32 to vector<8x256xi32>
    %257 = arith.cmpi sge, %17, %256 : vector<8x256xi32>
    %cst_107 = arith.constant 0.000000e+00 : f32
    %258 = vector.broadcast %cst_107 : f32 to vector<8x256xf32>
    %259 = arith.select %257, %255, %258 : vector<8x256xi1>, vector<8x256xf32>
    %c0_108 = arith.constant 0 : index
    %c0_109 = arith.constant 0 : index
    %260 = vector.load %arg6[%c0_108, %c0_109] : memref<320x256xf32, #tpu.memory_space<vmem>>, vector<8x256xf32>
    tpu.vector_store %arg6[%c0_108, %c0_109], %259 {strides = array<i32>} : memref<320x256xf32, #tpu.memory_space<vmem>>, vector<8x256xf32>,
    %c312 = arith.constant 312 : index
    %c0_110 = arith.constant 0 : index
    %261 = vector.load %arg6[%c312, %c0_110] : memref<320x256xf32, #tpu.memory_space<vmem>>, vector<8x256xf32>
    tpu.vector_store %arg6[%c312, %c0_110], %29 {strides = array<i32>} : memref<320x256xf32, #tpu.memory_space<vmem>>, vector<8x256xf32>,
    %c0_111 = arith.constant 0 : index
    %c0_112 = arith.constant 0 : index
    %262 = vector.load %arg2[%c0_111, %c0_112] : memref<32x320xf32, #tpu.memory_space<vmem>>, vector<32x320xf32>
    %c0_113 = arith.constant 0 : index
    %c0_114 = arith.constant 0 : index
    %263 = vector.load %arg6[%c0_113, %c0_114] : memref<320x256xf32, #tpu.memory_space<vmem>>, vector<320x256xf32>
    %cst_115 = arith.constant dense<0.000000e+00> : vector<32x256xf32>
    %264 = tpu.matmul %262, %263, %cst_115 {dimension_numbers = #tpu.dot_dimension_numbers<[1], [0], [0], [1], [0, 0, 1, 1], [], []>} : vector<32x320xf32>, vector<320x256xf32>, vector<32x256xf32> -> vector<32x256xf32>
    %cst_116 = arith.constant dense<0.000000e+00> : vector<32xf32>
    %265 = vector.multi_reduction <add>, %264, %cst_116 [1] : vector<32x256xf32> to vector<32xf32>
    %266 = vector.shape_cast %265 : vector<32xf32> to vector<32x1xf32>
    %cst_117 = arith.constant 3.906250e-03 : f32
    %267 = vector.broadcast %cst_117 : f32 to vector<32x1xf32>
    %268 = arith.mulf %266, %267 : vector<32x1xf32>
    %269 = arith.mulf %264, %264 : vector<32x256xf32>
    %cst_118 = arith.constant dense<0.000000e+00> : vector<32xf32>
    %270 = vector.multi_reduction <add>, %269, %cst_118 [1] : vector<32x256xf32> to vector<32xf32>
    %271 = vector.shape_cast %270 : vector<32xf32> to vector<32x1xf32>
    %cst_119 = arith.constant 3.906250e-03 : f32
    %272 = vector.broadcast %cst_119 : f32 to vector<32x1xf32>
    %273 = arith.mulf %271, %272 : vector<32x1xf32>
    %274 = arith.mulf %268, %268 : vector<32x1xf32>
    %275 = arith.subf %273, %274 : vector<32x1xf32>
    %c0_120 = arith.constant 0 : index
    %c0_121 = arith.constant 0 : index
    %276 = vector.load %arg3[%c0_120, %c0_121] : memref<32x1xf32, #tpu.memory_space<vmem>>, vector<32x1xf32>
    %cst_122 = arith.constant 9.99999974E-6 : f32
    %277 = vector.broadcast %cst_122 : f32 to vector<32x1xf32>
    %278 = arith.addf %275, %277 : vector<32x1xf32>
    %279 = math.rsqrt %278 : vector<32x1xf32>
    %280 = arith.mulf %276, %279 : vector<32x1xf32>
    %c0_123 = arith.constant 0 : index
    %c0_124 = arith.constant 0 : index
    %281 = vector.load %arg4[%c0_123, %c0_124] : memref<32x1xf32, #tpu.memory_space<vmem>>, vector<32x1xf32>
    %282 = arith.mulf %268, %280 : vector<32x1xf32>
    %283 = arith.subf %281, %282 : vector<32x1xf32>
    %284 = vector.broadcast %280 : vector<32x1xf32> to vector<32x256xf32>
    %285 = arith.mulf %264, %284 : vector<32x256xf32>
    %286 = vector.broadcast %283 : vector<32x1xf32> to vector<32x256xf32>
    %287 = arith.addf %285, %286 : vector<32x256xf32>
    %cst_125 = arith.constant 0.000000e+00 : f32
    %288 = vector.broadcast %cst_125 : f32 to vector<32x256xf32>
    %289 = arith.maximumf %287, %288 : vector<32x256xf32>
    %c0_126 = arith.constant 0 : index
    %c0_127 = arith.constant 0 : index
    %290 = vector.load %arg5[%c0_126, %c0_127] : memref<32x256xf32, #tpu.memory_space<vmem>>, vector<32x256xf32>
    tpu.vector_store %arg5[%c0_126, %c0_127], %289 {strides = array<i32>} : memref<32x256xf32, #tpu.memory_space<vmem>>, vector<32x256xf32>,
    return
  }
}

</mosaic_0001>

<bundles_post_ra>
// kernel: inception_forward.1
= control target key start
LH: loop header
LB: loop body
LE: loop exit
PB: predicated region body
PF: predicated region fallthrough
CT: control target
= control target key end

     0   :  { %v1211_v2 = vmov 0.0   ;;  %vm76_vm0 = vcmask 64512   ;;  %s1212_s24 = smov 1   ;;  %s1215_s25 = smov 127   ;;  %v22_v8 = vlaneseq  ;;  %s2005_s0 = inlined_call_operand.vmem [shape: f32[8,256], index: 0, kind: input, shape index: {}]   ;;  %s2006_s1 = inlined_call_operand.vmem [shape: f32[8,8], index: 1, kind: input, shape index: {}]   ;;  %s2007_s2 = inlined_call_operand.vmem [shape: f32[32,320], index: 2, kind: input, shape index: {}]   ;;  %s2008_s3 = inlined_call_operand.vmem [shape: f32[32,1], index: 3, kind: input, shape index: {}]   ;;  %s2009_s4 = inlined_call_operand.vmem [shape: f32[32,1], index: 4, kind: input, shape index: {}]   ;;  %s2010_s5 = inlined_call_operand.vmem [shape: f32[32,256], index: 5, kind: output, shape index: {}]  }
   0x1   :  { %v1284_v0 = vld [vmem:[%s2005_s0 + $0x8] sm:$0xff]  ;;  %v1289_v1 = vld [vmem:[%s2005_s0] sm:$0xff]  ;;  %144 = vmatprep.mubr.f32.mxu0 %v1211_v2  ;;  %s1213_s0 = smov 5   ;;  %s1216_s26 = smov 6  }
   0x2   :  { %v75_v3 = vld [vmem:[%s2006_s1] sm:$0xff]  ;;  %110 = vmatprep.subr.mxu0 %v1284_v0  ;;  %53 = vrot.lane.b32.xlu1 %v1284_v0, %s1212_s24  ;;  %s1214_s1 = smov 4   ;;  %s1217_s27 = smov 7   ;;  %v1376_v11 = vand.u32 127, %v22_v8  ;;  %v646_v32 = vld [vmem:[%s2007_s2 + $0x8] sm:$0xff] }
   0x3   :  { %111 = vmatpush1.msra.mxu0 %v1289_v1  ;;  %51 = vrot.lane.b32.xlu0 %v1289_v1, %s1212_s24  ;;  %s1218_s28 = smov 8   ;;  %s1219_s29 = smov 9  }
   0x4   :  { %1080 = vmatmul.mubr.msk.f32.vlgmr.msra.gmra.mxu0 %vm76_vm0, %v75_v3  ;;  %s1220_s30 = smov 10   ;;  %s1221_s6 = smov 11   ;;  %vm270_vm1 = vcmp.lt.s32.totalorder %v1376_v11, 5  ;;  %vm296_vm2 = vcmp.lt.s32.totalorder %v1376_v11, 6  ;;  %vm322_vm3 = vcmp.lt.s32.totalorder %v1376_v11, 7  ;;  %vm348_vm4 = vcmp.lt.s32.totalorder %v1376_v11, 8  ;;  %814 = vmatprep.mubr.f32.mxu1 %v646_v32 }
   0x5   :  { %903 = vmatprep.mubr.f32.mxu0 %v1211_v2  ;;  %s1222_s7 = smov 12   ;;  %s1223_s8 = smov 13   ;;  %vm374_vm5 = vcmp.lt.s32.totalorder %v1376_v11, 9  ;;  %vm400_vm6 = vcmp.lt.s32.totalorder %v1376_v11, 10  ;;  %vm426_vm7 = vcmp.lt.s32.totalorder %v1376_v11, 11  ;;  %vm452_vm8 = vcmp.lt.s32.totalorder %v1376_v11, 12 }
   0x6   :  { %s1224_s9 = smov 14   ;;  %s1225_s10 = smov 15   ;;  %vm478_vm9 = vcmp.lt.s32.totalorder %v1376_v11, 13  ;;  %vm504_vm10 = vcmp.lt.s32.totalorder %v1376_v11, 14  ;;  %vm55_vm11 = vcmp.lt.s32.totalorder %v1376_v11, 1  ;;  %vm49_vm12 = vcmp.gt.s32.totalorder %v1376_v11, 0 }
   0x7   :  { %s1226_s11 = smov 16   ;;  %s1227_s12 = smov 17   ;;  %vm244_vm13 = vcmp.lt.s32.totalorder %v1376_v11, 4  ;;  %vm247_vm0 = vcmp.ge.s32.totalorder %v1376_v11, 4 }
   0x8   :  { %s1228_s13 = smov 18   ;;  %s1229_s14 = smov 19  }
   0x9   :  { %s1230_s15 = smov 116   ;;  %s1231_s16 = smov 117  }
   0xa   :  { %s1232_s17 = smov 118   ;;  %s1233_s18 = smov 119  }
   0xb   :  { %s1234_s19 = smov 120   ;;  %s1235_s20 = smov 121  }
   0xc   :  { %s1236_s21 = smov 122   ;;  %s1237_s22 = smov 123  }
   0xd   :  { %s1238_s23 = smov 124  }
  0x74   :  { %v1366_v6 = vpop.permute.xlu1 %53 }
  0x75   :  { %v1368_v7 = vpop.permute.xlu0 %51 }
  0x76   :  { %v56_v32 = vsel %vm55_vm11, %v1368_v7, %v1366_v6 }
  0xc4   :  { %v1302_v4 = vpop.f32.mrf.mxu0 }
  0xc5   :  { %266 = vrot.lane.b32.xlu1 %v1302_v4, %s1213_s0  ;;  %240 = vrot.lane.b32.xlu0 %v1302_v4, %s1214_s1 }
  0xc6   :  { %v1310_v5 = vpop.f32.mrf.mxu0 }
  0xc9   :  { %64 = vrot.lane.b32.xlu1 %v1284_v0, %s1215_s25  ;;  %292 = vrot.lane.b32.xlu0 %v1302_v4, %s1216_s26 }
  0xcd   :  { %318 = vrot.lane.b32.xlu0 %v1302_v4, %s1217_s27  ;;  %268 = vrot.lane.b32.xlu1 %v1310_v5, %s1213_s0  ;;  %s1239_s0 = smov 125  }
  0xd1   :  { %344 = vrot.lane.b32.xlu0 %v1302_v4, %s1218_s28  ;;  %294 = vrot.lane.b32.xlu1 %v1310_v5, %s1216_s26  ;;  %s1241_s26 = smov 126  }
  0xd5   :  { %370 = vrot.lane.b32.xlu0 %v1302_v4, %s1219_s29  ;;  %320 = vrot.lane.b32.xlu1 %v1310_v5, %s1217_s27  ;;  %s1242_s27 = smov 110  }
  0xd9   :  { %396 = vrot.lane.b32.xlu0 %v1302_v4, %s1220_s30  ;;  %346 = vrot.lane.b32.xlu1 %v1310_v5, %s1218_s28  ;;  %s1243_s28 = smov 111  }
  0xdd   :  { %422 = vrot.lane.b32.xlu0 %v1302_v4, %s1221_s6  ;;  %372 = vrot.lane.b32.xlu1 %v1310_v5, %s1219_s29  ;;  %s1245_s29 = smov 113  }
  0xe1   :  { %448 = vrot.lane.b32.xlu0 %v1302_v4, %s1222_s7  ;;  %398 = vrot.lane.b32.xlu1 %v1310_v5, %s1220_s30 }
  0xe5   :  { %474 = vrot.lane.b32.xlu0 %v1302_v4, %s1223_s8  ;;  %424 = vrot.lane.b32.xlu1 %v1310_v5, %s1221_s6 }
  0xe9   :  { %500 = vrot.lane.b32.xlu0 %v1302_v4, %s1224_s9  ;;  %450 = vrot.lane.b32.xlu1 %v1310_v5, %s1222_s7  ;;  %s1247_s7 = smov 114  }
  0xed   :  { %526 = vrot.lane.b32.xlu0 %v1302_v4, %s1225_s10  ;;  %476 = vrot.lane.b32.xlu1 %v1310_v5, %s1223_s8  ;;  %s1248_s8 = smov 3  }
  0xf1   :  { %552 = vrot.lane.b32.xlu0 %v1302_v4, %s1226_s11  ;;  %502 = vrot.lane.b32.xlu1 %v1310_v5, %s1224_s9  ;;  %s1249_s9 = smov 115  }
  0xf5   :  { %578 = vrot.lane.b32.xlu0 %v1302_v4, %s1227_s12  ;;  %528 = vrot.lane.b32.xlu1 %v1310_v5, %s1225_s10 }
  0xf9   :  { %604 = vrot.lane.b32.xlu0 %v1302_v4, %s1228_s13  ;;  %554 = vrot.lane.b32.xlu1 %v1310_v5, %s1226_s11 }
  0xfd   :  { %630 = vrot.lane.b32.xlu0 %v1302_v4, %s1229_s14  ;;  %580 = vrot.lane.b32.xlu1 %v1310_v5, %s1227_s12 }
 0x101   :  { %435 = vrot.lane.b32.xlu0 %v1302_v4, %s1230_s15  ;;  %606 = vrot.lane.b32.xlu1 %v1310_v5, %s1228_s13 }
 0x105   :  { %409 = vrot.lane.b32.xlu0 %v1302_v4, %s1231_s16  ;;  %632 = vrot.lane.b32.xlu1 %v1310_v5, %s1229_s14 }
 0x109   :  { %383 = vrot.lane.b32.xlu0 %v1302_v4, %s1232_s17  ;;  %437 = vrot.lane.b32.xlu1 %v1310_v5, %s1230_s15 }
 0x10d   :  { %357 = vrot.lane.b32.xlu0 %v1302_v4, %s1233_s18  ;;  %411 = vrot.lane.b32.xlu1 %v1310_v5, %s1231_s16 }
 0x111   :  { %331 = vrot.lane.b32.xlu0 %v1302_v4, %s1234_s19  ;;  %385 = vrot.lane.b32.xlu1 %v1310_v5, %s1232_s17 }
 0x115   :  { %305 = vrot.lane.b32.xlu0 %v1302_v4, %s1235_s20  ;;  %359 = vrot.lane.b32.xlu1 %v1310_v5, %s1233_s18 }
 0x119   :  { %279 = vrot.lane.b32.xlu0 %v1302_v4, %s1236_s21  ;;  %333 = vrot.lane.b32.xlu1 %v1310_v5, %s1234_s19 }
 0x11d   :  { %307 = vrot.lane.b32.xlu1 %v1310_v5, %s1235_s20  ;;  %242 = vrot.lane.b32.xlu0 %v1310_v5, %s1214_s1  ;;  %s1240_s1 = smov 109  }
 0x121   :  { %281 = vrot.lane.b32.xlu1 %v1310_v5, %s1236_s21  ;;  %62 = vrot.lane.b32.xlu0 %v1289_v1, %s1215_s25 }
 0x125   :  { %255 = vrot.lane.b32.xlu1 %v1310_v5, %s1237_s22  ;;  %253 = vrot.lane.b32.xlu0 %v1302_v4, %s1237_s22 }
 0x129   :  { %229 = vrot.lane.b32.xlu1 %v1310_v5, %s1238_s23  ;;  %227 = vrot.lane.b32.xlu0 %v1302_v4, %s1238_s23 }
 0x12d   :  { %203 = vrot.lane.b32.xlu1 %v1310_v5, %s1239_s0  ;;  %201 = vrot.lane.b32.xlu0 %v1302_v4, %s1239_s0 }
 0x131   :  { %619 = vrot.lane.b32.xlu1 %v1310_v5, %s1240_s1  ;;  %617 = vrot.lane.b32.xlu0 %v1302_v4, %s1240_s1 }
 0x135   :  { %177 = vrot.lane.b32.xlu1 %v1310_v5, %s1241_s26  ;;  %175 = vrot.lane.b32.xlu0 %v1302_v4, %s1241_s26 }
 0x137   :  { %v267_v9 = vpop.permute.xlu1 %266  ;;  %v1372_v10 = vpop.permute.xlu0 %240 }
 0x139   :  { %593 = vrot.lane.b32.xlu1 %v1310_v5, %s1242_s27  ;;  %591 = vrot.lane.b32.xlu0 %v1302_v4, %s1242_s27 }
 0x13b   :  { %v1378_v12 = vpop.permute.xlu1 %64  ;;  %v293_v13 = vpop.permute.xlu0 %292 }
 0x13d   :  { %155 = vrot.lane.b32.xlu1 %v1310_v5, %s1215_s25  ;;  %153 = vrot.lane.b32.xlu0 %v1302_v4, %s1215_s25  ;;  %s1244_s25 = smov 112  }
 0x13f   :  { %v319_v14 = vpop.permute.xlu0 %318  ;;  %v269_v15 = vpop.permute.xlu1 %268 }
 0x140   :  { %v1385_v16 = vsel %vm270_vm1, %v267_v9, %v269_v15  ;;  %v1387_v17 = vsel %vm270_vm1, %v269_v15, %v267_v9 }
 0x141   :  { %567 = vrot.lane.b32.xlu1 %v1310_v5, %s1243_s28  ;;  %565 = vrot.lane.b32.xlu0 %v1302_v4, %s1243_s28 }
 0x143   :  { %v345_v18 = vpop.permute.xlu0 %344  ;;  %v295_v19 = vpop.permute.xlu1 %294 }
 0x144   :  { %v1392_v20 = vsel %vm296_vm2, %v293_v13, %v295_v19  ;;  %v1394_v21 = vsel %vm296_vm2, %v295_v19, %v293_v13  ;;  %v24_v19 = vadd.s32 128, %v1376_v11  ;;  %vm60_vm2 = vcmp.lt.s32.totalorder %v1376_v11, 127 }
 0x145   :  { %541 = vrot.lane.b32.xlu1 %v1310_v5, %s1244_s25  ;;  %539 = vrot.lane.b32.xlu0 %v1302_v4, %s1244_s25 }
 0x147   :  { %v371_v22 = vpop.permute.xlu0 %370  ;;  %v321_v23 = vpop.permute.xlu1 %320 }
 0x148   :  { %v1399_v24 = vsel %vm322_vm3, %v319_v14, %v321_v23  ;;  %v1401_v25 = vsel %vm322_vm3, %v321_v23, %v319_v14  ;;  %vm273_vm3 = vcmp.ge.s32.totalorder %v1376_v11, 5 }
 0x149   :  { %165 = vrot.lane.b32.xlu1 %v1310_v5, %s1212_s24  ;;  %163 = vrot.lane.b32.xlu0 %v1302_v4, %s1212_s24  ;;  %s1246_s24 = smov 2  }
 0x14b   :  { %v397_v26 = vpop.permute.xlu0 %396  ;;  %v347_v27 = vpop.permute.xlu1 %346 }
 0x14c   :  { %v1408_v28 = vsel %vm348_vm4, %v345_v18, %v347_v27  ;;  %v1410_v29 = vsel %vm348_vm4, %v347_v27, %v345_v18 }
 0x14d   :  { %515 = vrot.lane.b32.xlu1 %v1310_v5, %s1245_s29  ;;  %513 = vrot.lane.b32.xlu0 %v1302_v4, %s1245_s29 }
 0x14f   :  { %v423_v30 = vpop.permute.xlu0 %422  ;;  %v373_v31 = vpop.permute.xlu1 %372 }
 0x150   :  { %v1418_v33 = vsel %vm374_vm5, %v371_v22, %v373_v31  ;;  %v1420_v34 = vsel %vm374_vm5, %v373_v31, %v371_v22  ;;  %v57_v31 = vsel %vm55_vm11, %v1366_v6, %v1368_v7 }
 0x151   :  { %190 = vrot.lane.b32.xlu1 %v1310_v5, %s1246_s24  ;;  %188 = vrot.lane.b32.xlu0 %v1302_v4, %s1246_s24 }
 0x153   :  { %v449_v35 = vpop.permute.xlu0 %448  ;;  %v399_v36 = vpop.permute.xlu1 %398 }
 0x154   :  { %v1425_v37 = vsel %vm400_vm6, %v397_v26, %v399_v36  ;;  %v1427_v38 = vsel %vm400_vm6, %v399_v36, %v397_v26  ;;  %v1496_v26 = vand.u32 127, %v24_v19  ;;  %vm299_vm6 = vcmp.ge.s32.totalorder %v1376_v11, 6 }
 0x155   :  { %489 = vrot.lane.b32.xlu1 %v1310_v5, %s1247_s7  ;;  %487 = vrot.lane.b32.xlu0 %v1302_v4, %s1247_s7 }
 0x156   :  { %vm50_vm14 = vcmp.gt.s32.totalorder %v1496_v26, 0  ;;  %vm248_vm15 = vcmp.ge.s32.totalorder %v1496_v26, 4  ;;  %vm274_vm1 = vcmp.ge.s32.totalorder %v1496_v26, 5  ;;  %vm61_vm4 = vcmp.lt.s32.totalorder %v1496_v26, 127 }
 0x157   :  { %v475_v39 = vpop.permute.xlu0 %474  ;;  %v425_v40 = vpop.permute.xlu1 %424  ;;  %vm300_vm5 = vcmp.ge.s32.totalorder %v1496_v26, 6 }
 0x158   :  { %v1432_v41 = vsel %vm426_vm7, %v423_v30, %v425_v40  ;;  %v1434_v42 = vsel %vm426_vm7, %v425_v40, %v423_v30  ;;  %vm326_vm7 = vcmp.ge.s32.totalorder %v1496_v26, 7 }
 0x159   :  { %216 = vrot.lane.b32.xlu1 %v1310_v5, %s1248_s8  ;;  %214 = vrot.lane.b32.xlu0 %v1302_v4, %s1248_s8 }
 0x15b   :  { %v501_v43 = vpop.permute.xlu0 %500  ;;  %v451_v44 = vpop.permute.xlu1 %450 }
 0x15c   :  { %v1439_v45 = vsel %vm452_vm8, %v449_v35, %v451_v44  ;;  %v1441_v46 = vsel %vm452_vm8, %v451_v44, %v449_v35  ;;  %v59_v44 = vsel %vm50_vm14, %v56_v32, -inf  ;;  %vm325_vm8 = vcmp.ge.s32.totalorder %v1376_v11, 7 }
 0x15d   :  { %463 = vrot.lane.b32.xlu1 %v1310_v5, %s1249_s9  ;;  %461 = vrot.lane.b32.xlu0 %v1302_v4, %s1249_s9  ;;  %vm404_vm14 = vcmp.ge.s32.totalorder %v1496_v26, 10 }
 0x15f   :  { %v1446_v47 = vpop.permute.xlu0 %526  ;;  %v477_v48 = vpop.permute.xlu1 %476 }
 0x160   :  { %v1448_v49 = vsel %vm478_vm9, %v475_v39, %v477_v48  ;;  %v1450_v50 = vsel %vm478_vm9, %v477_v48, %v475_v39  ;;  %v58_v39 = vsel %vm49_vm12, %v57_v31, -inf  ;;  %v72_v48 = vmax.f32 %v1284_v0, %v59_v44 }
 0x161   :  { %v71_v6 = vmax.f32 %v1289_v1, %v58_v39  ;;  %vm352_vm9 = vcmp.ge.s32.totalorder %v1496_v26, 8  ;;  %vm378_vm12 = vcmp.ge.s32.totalorder %v1496_v26, 9 }
 0x163   :  { %v1453_v51 = vpop.permute.xlu0 %552  ;;  %v503_v52 = vpop.permute.xlu1 %502 }
 0x164   :  { %v1455_v53 = vsel %vm504_vm10, %v501_v43, %v503_v52  ;;  %v1457_v54 = vsel %vm504_vm10, %v503_v52, %v501_v43  ;;  %vm351_vm10 = vcmp.ge.s32.totalorder %v1376_v11, 8 }
 0x167   :  { %v1459_v55 = vpop.permute.xlu0 %578  ;;  %v1461_v56 = vpop.permute.xlu1 %528 }
 0x16b   :  { %v1463_v57 = vpop.permute.xlu0 %604  ;;  %v1465_v58 = vpop.permute.xlu1 %554 }
 0x16f   :  { %v1467_v59 = vpop.permute.xlu0 %630  ;;  %v1469_v60 = vpop.permute.xlu1 %580 }
 0x173   :  { %v1471_v61 = vpop.permute.xlu0 %435  ;;  %v1473_v62 = vpop.permute.xlu1 %606 }
 0x177   :  { %v1475_v63 = vpop.permute.xlu0 %409  ;;  %v1477_v3 = vpop.permute.xlu1 %632 }
 0x17b   :  { %v1479_v8 = vpop.permute.xlu0 %383  ;;  %v1481_v9 = vpop.permute.xlu1 %437 }
 0x17f   :  { %v1483_v13 = vpop.permute.xlu0 %357  ;;  %v1485_v14 = vpop.permute.xlu1 %411 }
 0x183   :  { %v1487_v15 = vpop.permute.xlu0 %331  ;;  %v1489_v18 = vpop.permute.xlu1 %385 }
 0x187   :  { %v1492_v22 = vpop.permute.xlu0 %305  ;;  %v1494_v23 = vpop.permute.xlu1 %359 }
 0x18b   :  { %v1499_v27 = vpop.permute.xlu0 %279  ;;  %v1501_v30 = vpop.permute.xlu1 %333 }
 0x18f   :  { %v1515_v35 = vpop.permute.xlu1 %307  ;;  %v243_v36 = vpop.permute.xlu0 %242 }
 0x190   :  { %v245_v40 = vsel %vm244_vm13, %v1372_v10, %v243_v36  ;;  %v246_v43 = vsel %vm244_vm13, %v243_v36, %v1372_v10  ;;  %vm377_vm13 = vcmp.ge.s32.totalorder %v1376_v11, 9 }
 0x191   :  { %1085 = vmatprep.subr.msk.mxu1 %vm248_vm15, %v245_v40  ;;  %vm403_vm15 = vcmp.ge.s32.totalorder %v1376_v11, 10 }
 0x192   :  { %1086 = vmatpush1.msk.msra.mxu1 %vm247_vm0, %v246_v43  ;;  %vm430_vm0 = vcmp.ge.s32.totalorder %v1496_v26, 11 }
 0x193   :  { %v1526_v7 = vpop.permute.xlu1 %281  ;;  %1087 = vmatprep.subr.msk.mxu1 %vm274_vm1, %v1385_v16  ;;  %v63_v10 = vpop.permute.xlu0 %62  ;;  %vm429_vm1 = vcmp.ge.s32.totalorder %v1376_v11, 11 }
 0x194   :  { %v67_v52 = vsel %vm60_vm2, %v63_v10, %v1378_v12  ;;  %v68_v19 = vsel %vm60_vm2, %v1378_v12, %v63_v10  ;;  %1088 = vmatpush1.msk.msra.mxu1 %vm273_vm3, %v1387_v17  ;;  %vm456_vm3 = vcmp.ge.s32.totalorder %v1496_v26, 12 }
 0x195   :  { %v69_v1 = vsel %vm60_vm2, %v67_v52, -inf  ;;  %v70_v16 = vsel %vm61_vm4, %v68_v19, -inf  ;;  %1089 = vmatprep.subr.msk.mxu1 %vm300_vm5, %v1392_v20  ;;  %vm455_vm5 = vcmp.ge.s32.totalorder %v1376_v11, 12 }
 0x196   :  { %v73_v0 = vmax.f32 %v71_v6, %v69_v1  ;;  %v74_v31 = vmax.f32 %v72_v48, %v70_v16  ;;  %1090 = vmatpush1.msk.msra.mxu1 %vm299_vm6, %v1394_v21  ;;  %vm482_vm6 = vcmp.ge.s32.totalorder %v1496_v26, 13 }
 0x197   :  { %v1547_v12 = vpop.permute.xlu1 %255  ;;  %1091 = vmatprep.subr.msk.mxu1 %vm326_vm7, %v1399_v24  ;;  %v1550_v17 = vpop.permute.xlu0 %253  ;;  %vm621_vm7 = vcmp.lt.s32.totalorder %v1376_v11, 109 }
 0x198   :  { %1092 = vmatpush1.msk.msra.mxu1 %vm325_vm8, %v1401_v25  ;;  %855 = vmatprep.subr.mxu0 %v74_v31  ;;  %vm481_vm8 = vcmp.ge.s32.totalorder %v1376_v11, 13 }
 0x199   :  { %1093 = vmatprep.subr.msk.mxu1 %vm352_vm9, %v1408_v28  ;;  %856 = vmatpush1.msra.mxu0 %v73_v0  ;;  %vm508_vm9 = vcmp.ge.s32.totalorder %v1496_v26, 14 }
 0x19a   :  { %1094 = vmatpush1.msk.msra.mxu1 %vm351_vm10, %v1410_v29  ;;  %vm625_vm10 = vcmp.lt.s32.totalorder %v1496_v26, 109 }
 0x19b   :  { %v1559_v20 = vpop.permute.xlu1 %229  ;;  %1095 = vmatprep.subr.msk.mxu1 %vm378_vm12, %v1418_v33  ;;  %v1562_v21 = vpop.permute.xlu0 %227  ;;  %vm530_vm12 = vcmp.lt.s32.totalorder %v1376_v11, 15 }
 0x19c   :  { %1096 = vmatpush1.msk.msra.mxu1 %vm377_vm13, %v1420_v34  ;;  %vm507_vm13 = vcmp.ge.s32.totalorder %v1376_v11, 14 }
 0x19d   :  { %1097 = vmatprep.subr.msk.mxu1 %vm404_vm14, %v1425_v37  ;;  %vm534_vm14 = vcmp.ge.s32.totalorder %v1496_v26, 15  ;;  %v531_v37 = vsel %vm530_vm12, %v1446_v47, %v1461_v56 }
 0x19e   :  { %1098 = vmatpush1.msk.msra.mxu1 %vm403_vm15, %v1427_v38  ;;  %vm556_vm15 = vcmp.lt.s32.totalorder %v1376_v11, 16  ;;  %v532_v38 = vsel %vm530_vm12, %v1461_v56, %v1446_v47  ;;  %vm599_vm12 = vcmp.lt.s32.totalorder %v1496_v26, 110 }
 0x19f   :  { %v1571_v24 = vpop.permute.xlu1 %203  ;;  %1099 = vmatprep.subr.msk.mxu1 %vm430_vm0, %v1432_v41  ;;  %v1574_v25 = vpop.permute.xlu0 %201  ;;  %vm533_vm0 = vcmp.ge.s32.totalorder %v1376_v11, 15 }
 0x1a0   :  { %1100 = vmatpush1.msk.msra.mxu1 %vm429_vm1, %v1434_v42  ;;  %vm560_vm1 = vcmp.ge.s32.totalorder %v1496_v26, 16 }
 0x1a1   :  { %1101 = vmatprep.subr.msk.mxu1 %vm456_vm3, %v1439_v45  ;;  %vm582_vm3 = vcmp.lt.s32.totalorder %v1376_v11, 17  ;;  %v557_v45 = vsel %vm556_vm15, %v1453_v51, %v1465_v58 }
 0x1a2   :  { %1102 = vmatpush1.msk.msra.mxu1 %vm455_vm5, %v1441_v46  ;;  %vm559_vm5 = vcmp.ge.s32.totalorder %v1376_v11, 16  ;;  %v558_v46 = vsel %vm556_vm15, %v1465_v58, %v1453_v51  ;;  %v583_v47 = vsel %vm582_vm3, %v1459_v55, %v1469_v60  ;;  %vm638_vm15 = vcmp.ge.s32.totalorder %v1496_v26, 19 }
 0x1a3   :  { %v620_v28 = vpop.permute.xlu1 %619  ;;  %1103 = vmatprep.subr.msk.mxu1 %vm482_vm6, %v1448_v49  ;;  %v618_v29 = vpop.permute.xlu0 %617  ;;  %vm586_vm6 = vcmp.ge.s32.totalorder %v1496_v26, 17  ;;  %v584_v49 = vsel %vm582_vm3, %v1469_v60, %v1459_v55  ;;  %vm443_vm3 = vcmp.lt.s32.totalorder %v1496_v26, 116 }
 0x1a4   :  { %v622_v33 = vsel %vm621_vm7, %v618_v29, %v620_v28  ;;  %v623_v34 = vsel %vm621_vm7, %v620_v28, %v618_v29  ;;  %1104 = vmatpush1.msk.msra.mxu1 %vm481_vm8, %v1450_v50  ;;  %vm595_vm8 = vcmp.lt.s32.totalorder %v1376_v11, 110 }
 0x1a5   :  { %1105 = vmatprep.subr.msk.mxu1 %vm508_vm9, %v1455_v53  ;;  %1147 = vmatprep.subr.msk.mxu0 %vm625_vm10, %v623_v34  ;;  %vm585_vm9 = vcmp.ge.s32.totalorder %v1376_v11, 17  ;;  %vm612_vm10 = vcmp.ge.s32.totalorder %v1496_v26, 18 }
 0x1a6   :  { %1106 = vmatpush1.msk.msra.mxu1 %vm507_vm13, %v1457_v54  ;;  %1148 = vmatpush1.msk.msra.mxu0 %vm621_vm7, %v622_v33  ;;  %vm608_vm7 = vcmp.lt.s32.totalorder %v1376_v11, 18  ;;  %vm634_vm13 = vcmp.lt.s32.totalorder %v1376_v11, 19 }
 0x1a7   :  { %v1610_v41 = vpop.permute.xlu1 %177  ;;  %1107 = vmatprep.subr.msk.mxu1 %vm534_vm14, %v531_v37  ;;  %v1612_v42 = vpop.permute.xlu0 %175  ;;  %vm611_vm14 = vcmp.ge.s32.totalorder %v1376_v11, 18  ;;  %v609_v53 = vsel %vm608_vm7, %v1463_v57, %v1473_v62  ;;  %v610_v55 = vsel %vm608_vm7, %v1473_v62, %v1463_v57  ;;  %v635_v58 = vsel %vm634_vm13, %v1467_v59, %v1477_v3 }
 0x1a8   :  { %1108 = vmatpush1.msk.msra.mxu1 %vm533_vm0, %v532_v38  ;;  %vm439_vm0 = vcmp.lt.s32.totalorder %v1376_v11, 116  ;;  %v636_v57 = vsel %vm634_vm13, %v1477_v3, %v1467_v59  ;;  %vm387_vm7 = vcmp.lt.s32.totalorder %v1376_v11, 118  ;;  %vm365_vm13 = vcmp.lt.s32.totalorder %v1496_v26, 119 }
 0x1a9   :  { %1109 = vmatprep.subr.msk.mxu1 %vm560_vm1, %v557_v45  ;;  %vm637_vm1 = vcmp.ge.s32.totalorder %v1376_v11, 19  ;;  %v441_v32 = vsel %vm439_vm0, %v1481_v9, %v1471_v61  ;;  %v440_v59 = vsel %vm439_vm0, %v1471_v61, %v1481_v9  ;;  %v389_v39 = vsel %vm387_vm7, %v1489_v18, %v1479_v8 }
 0x1aa   :  { %1110 = vmatpush1.msk.msra.mxu1 %vm559_vm5, %v558_v46  ;;  %vm413_vm5 = vcmp.lt.s32.totalorder %v1376_v11, 117 }
 0x1ab   :  { %v594_v50 = vpop.permute.xlu1 %593  ;;  %1111 = vmatprep.subr.msk.mxu1 %vm586_vm6, %v583_v47  ;;  %v592_v51 = vpop.permute.xlu0 %591  ;;  %vm417_vm6 = vcmp.lt.s32.totalorder %v1496_v26, 117  ;;  %v415_v3 = vsel %vm413_vm5, %v1485_v14, %v1475_v63  ;;  %v414_v61 = vsel %vm413_vm5, %v1475_v63, %v1485_v14  ;;  %v388_v63 = vsel %vm387_vm7, %v1479_v8, %v1489_v18 }
 0x1ac   :  { %v596_v54 = vsel %vm595_vm8, %v592_v51, %v594_v50  ;;  %v597_v56 = vsel %vm595_vm8, %v594_v50, %v592_v51  ;;  %1112 = vmatpush1.msk.msra.mxu1 %vm585_vm9, %v584_v49  ;;  %vm391_vm9 = vcmp.lt.s32.totalorder %v1496_v26, 118  ;;  %v645_v50 = vld [vmem:[%s2007_s2] sm:$0xff] }
 0x1ad   :  { %1113 = vmatprep.subr.msk.mxu1 %vm612_vm10, %v609_v53  ;;  %1149 = vmatprep.subr.msk.mxu0 %vm599_vm12, %v597_v56  ;;  %vm573_vm10 = vcmp.lt.s32.totalorder %v1496_v26, 111  ;;  %vm361_vm12 = vcmp.lt.s32.totalorder %v1376_v11, 119  ;;  %v649_v56 = vld [vmem:[%s2007_s2 + $0x20] sm:$0xff] }
 0x1ae   :  { %1114 = vmatpush1.msk.msra.mxu1 %vm611_vm14, %v610_v55  ;;  %1150 = vmatpush1.msk.msra.mxu0 %vm595_vm8, %v596_v54  ;;  %vm569_vm8 = vcmp.lt.s32.totalorder %v1376_v11, 111  ;;  %vm335_vm14 = vcmp.lt.s32.totalorder %v1376_v11, 120  ;;  %v363_v14 = vsel %vm361_vm12, %v1494_v23, %v1483_v13  ;;  %v362_v8 = vsel %vm361_vm12, %v1483_v13, %v1494_v23 }
 0x1af   :  { %v1666_v60 = vpop.permute.xlu1 %155  ;;  %1115 = vmatprep.subr.msk.mxu1 %vm638_vm15, %v635_v58  ;;  %v1668_v62 = vpop.permute.xlu0 %153  ;;  %vm543_vm15 = vcmp.lt.s32.totalorder %v1376_v11, 112  ;;  %v337_v6 = vsel %vm335_vm14, %v1501_v30, %v1487_v15  ;;  %v336_v13 = vsel %vm335_vm14, %v1487_v15, %v1501_v30 }
 0x1b0   :  { %1116 = vmatpush1.msk.msra.mxu1 %vm637_vm1, %v636_v57  ;;  %vm547_vm1 = vcmp.lt.s32.totalorder %v1496_v26, 112  ;;  %v647_v57 = vld [vmem:[%s2007_s2 + $0x10] sm:$0xff] }
 0x1b1   :  { %1117 = vmatprep.subr.msk.mxu1 %vm443_vm3, %v441_v32  ;;  %vm309_vm3 = vcmp.lt.s32.totalorder %v1376_v11, 121  ;;  %v655_v32 = vld [vmem:[%s2007_s2 + $0x50] sm:$0xff] }
 0x1b2   :  { %1118 = vmatpush2.msk.msra.mxu1 %vm439_vm0, %v440_v59  ;;  %vm339_vm0 = vcmp.lt.s32.totalorder %v1496_v26, 120  ;;  %v311_v23 = vsel %vm309_vm3, %v1515_v35, %v1492_v22  ;;  %v310_v15 = vsel %vm309_vm3, %v1492_v22, %v1515_v35  ;;  %v653_v59 = vld [vmem:[%s2007_s2 + $0x40] sm:$0xff] }
 0x1b3   :  { %v568_v9 = vpop.permute.xlu1 %567  ;;  %1119 = vmatprep.subr.msk.mxu1 %vm417_vm6, %v415_v3  ;;  %v566_v36 = vpop.permute.xlu0 %565  ;;  %vm283_vm6 = vcmp.lt.s32.totalorder %v1376_v11, 122  ;;  %v654_v3 = vld [vmem:[%s2007_s2 + $0x48] sm:$0xff] }
 0x1b4   :  { %v570_v40 = vsel %vm569_vm8, %v566_v36, %v568_v9  ;;  %v571_v43 = vsel %vm569_vm8, %v568_v9, %v566_v36  ;;  %1120 = vmatpush2.msk.msra.mxu1 %vm413_vm5, %v414_v61  ;;  %vm313_vm5 = vcmp.lt.s32.totalorder %v1496_v26, 121  ;;  %v285_v19 = vsel %vm283_vm6, %v1526_v7, %v1499_v27  ;;  %v656_v61 = vld [vmem:[%s2007_s2 + $0x58] sm:$0xff] }
 0x1b5   :  { %1121 = vmatprep.subr.msk.mxu1 %vm391_vm9, %v389_v39  ;;  %1151 = vmatprep.subr.msk.mxu0 %vm573_vm10, %v571_v43  ;;  %vm261_vm9 = vcmp.lt.s32.totalorder %v1496_v26, 123  ;;  %v284_v22 = vsel %vm283_vm6, %v1499_v27, %v1526_v7  ;;  %vm231_vm10 = vcmp.lt.s32.totalorder %v1376_v11, 124 }
 0x1b6   :  { %1122 = vmatpush2.msk.msra.mxu1 %vm387_vm7, %v388_v63  ;;  %1152 = vmatpush1.msk.msra.mxu0 %vm569_vm8, %v570_v40  ;;  %vm287_vm7 = vcmp.lt.s32.totalorder %v1496_v26, 122  ;;  %vm257_vm8 = vcmp.lt.s32.totalorder %v1376_v11, 123  ;;  %v233_v16 = vsel %vm231_vm10, %v1559_v20, %v1562_v21 }
 0x1b7   :  { %v542_v18 = vpop.permute.xlu1 %541  ;;  %1123 = vmatprep.subr.msk.mxu1 %vm365_vm13, %v363_v14  ;;  %v540_v44 = vpop.permute.xlu0 %539  ;;  %v259_v35 = vsel %vm257_vm8, %v1547_v12, %v1550_v17  ;;  %vm235_vm13 = vcmp.lt.s32.totalorder %v1496_v26, 124  ;;  %v258_v27 = vsel %vm257_vm8, %v1550_v17, %v1547_v12  ;;  %v232_v12 = vsel %vm231_vm10, %v1562_v21, %v1559_v20 }
 0x1b8   :  { %v544_v10 = vsel %vm543_vm15, %v540_v44, %v542_v18  ;;  %v545_v48 = vsel %vm543_vm15, %v542_v18, %v540_v44  ;;  %1124 = vmatpush2.msk.msra.mxu1 %vm361_vm12, %v362_v8  ;;  %vm517_vm12 = vcmp.lt.s32.totalorder %v1376_v11, 113 }
 0x1b9   :  { %1125 = vmatprep.subr.msk.mxu1 %vm339_vm0, %v337_v6  ;;  %1153 = vmatprep.subr.msk.mxu0 %vm547_vm1, %v545_v48  ;;  %vm209_vm0 = vcmp.lt.s32.totalorder %v1496_v26, 125  ;;  %vm179_vm1 = vcmp.lt.s32.totalorder %v1376_v11, 126 }
 0x1ba   :  { %1126 = vmatpush2.msk.msra.mxu1 %vm335_vm14, %v336_v13  ;;  %1154 = vmatpush1.msk.msra.mxu0 %vm543_vm15, %v544_v10  ;;  %vm521_vm14 = vcmp.lt.s32.totalorder %v1496_v26, 113  ;;  %vm205_vm15 = vcmp.lt.s32.totalorder %v1376_v11, 125  ;;  %v181_v29 = vsel %vm179_vm1, %v1610_v41, %v1612_v42  ;;  %v180_v33 = vsel %vm179_vm1, %v1612_v42, %v1610_v41 }
 0x1bb   :  { %v166_v30 = vpop.permute.xlu1 %165  ;;  %1127 = vmatprep.subr.msk.mxu1 %vm313_vm5, %v311_v23  ;;  %v164_v52 = vpop.permute.xlu0 %163  ;;  %v207_v17 = vsel %vm205_vm15, %v1571_v24, %v1574_v25  ;;  %v206_v20 = vsel %vm205_vm15, %v1574_v25, %v1571_v24  ;;  %vm491_vm5 = vcmp.lt.s32.totalorder %v1376_v11, 114  ;;  %v158_v24 = vsel %vm60_vm2, %v1666_v60, %v1668_v62 }
 0x1bc   :  { %1128 = vmatpush2.msk.msra.mxu1 %vm309_vm3, %v310_v15  ;;  %vm183_vm3 = vcmp.lt.s32.totalorder %v1496_v26, 126  ;;  %v157_v25 = vsel %vm60_vm2, %v1668_v62, %v1666_v60  ;;  %v167_v42 = vsel %vm55_vm11, %v164_v52, %v166_v30  ;;  %v168_v45 = vsel %vm55_vm11, %v166_v30, %v164_v52  ;;  %v652_v60 = vld [vmem:[%s2007_s2 + $0x38] sm:$0xff]  ;;  %v650_v62 = vld [vmem:[%s2007_s2 + $0x28] sm:$0xff] }
 0x1bd   :  { %1129 = vmatprep.subr.msk.mxu1 %vm287_vm7, %v285_v19  ;;  %vm170_vm7 = vcmp.ge.s32.totalorder %v1496_v26, 1  ;;  %vm221_vm11 = vcmp.ge.s32.totalorder %v1376_v11, 3 }
 0x1be   :  { %1130 = vmatpush2.msk.msra.mxu1 %vm283_vm6, %v284_v22  ;;  %vm495_vm6 = vcmp.lt.s32.totalorder %v1496_v26, 114 }
 0x1bf   :  { %v516_v7 = vpop.permute.xlu1 %515  ;;  %1131 = vmatprep.subr.msk.mxu1 %vm261_vm9, %v259_v35  ;;  %v514_v1 = vpop.permute.xlu0 %513  ;;  %vm169_vm9 = vcmp.ge.s32.totalorder %v1376_v11, 1 }
 0x1c0   :  { %v518_v0 = vsel %vm517_vm12, %v514_v1, %v516_v7  ;;  %v519_v31 = vsel %vm517_vm12, %v516_v7, %v514_v1  ;;  %1132 = vmatpush2.msk.msra.mxu1 %vm257_vm8, %v258_v27  ;;  %vm192_vm8 = vcmp.lt.s32.totalorder %v1376_v11, 2 }
 0x1c1   :  { %1133 = vmatprep.subr.msk.mxu1 %vm235_vm13, %v233_v16  ;;  %1155 = vmatprep.subr.msk.mxu0 %vm521_vm14, %v519_v31  ;;  %vm465_vm13 = vcmp.lt.s32.totalorder %v1376_v11, 115  ;;  %vm469_vm14 = vcmp.lt.s32.totalorder %v1496_v26, 115 }
 0x1c2   :  { %1134 = vmatpush2.msk.msra.mxu1 %vm231_vm10, %v232_v12  ;;  %1156 = vmatpush1.msk.msra.mxu0 %vm517_vm12, %v518_v0  ;;  %vm195_vm10 = vcmp.ge.s32.totalorder %v1376_v11, 2  ;;  %vm222_vm12 = vcmp.ge.s32.totalorder %v1496_v26, 3 }
 0x1c3   :  { %v191_v21 = vpop.permute.xlu1 %190  ;;  %1135 = vmatprep.subr.msk.mxu1 %vm209_vm0, %v207_v17  ;;  %v189_v28 = vpop.permute.xlu0 %188 }
 0x1c4   :  { %1136 = vmatpush2.msk.msra.mxu1 %vm205_vm15, %v206_v20  ;;  %v193_v47 = vsel %vm192_vm8, %v189_v28, %v191_v21  ;;  %vm737_vm15 = vcmask 523264  }
 0x1c5   :  { %1137 = vmatprep.subr.msk.mxu1 %vm183_vm3, %v181_v29 }
 0x1c6   :  { %1138 = vmatpush2.msk.msra.mxu1 %vm179_vm1, %v180_v33 }
 0x1c7   :  { %v490_v34 = vpop.permute.xlu1 %489  ;;  %1139 = vmatprep.subr.msk.mxu1 %vm61_vm4, %v158_v24  ;;  %v488_v37 = vpop.permute.xlu0 %487  ;;  %vm196_vm4 = vcmp.ge.s32.totalorder %v1496_v26, 2  ;;  %v648_v26 = vld [vmem:[%s2007_s2 + $0x18] sm:$0xff] }
 0x1c8   :  { %v492_v38 = vsel %vm491_vm5, %v488_v37, %v490_v34  ;;  %v493_v41 = vsel %vm491_vm5, %v490_v34, %v488_v37  ;;  %1140 = vmatpush2.msk.msra.mxu1 %vm60_vm2, %v157_v25  ;;  %vm218_vm2 = vcmp.lt.s32.totalorder %v1376_v11, 3  ;;  %v651_v11 = vld [vmem:[%s2007_s2 + $0x30] sm:$0xff] }
 0x1c9   :  { %806 = vmatprep.subr.mxu1 %v1310_v5  ;;  %1157 = vmatprep.subr.msk.mxu0 %vm495_vm6, %v493_v41  ;;  %v1250_v41 = vmov 0  }
 0x1ca   :  { %807 = vmatpush2.msra.mxu1 %v1302_v4  ;;  %1158 = vmatpush1.msk.msra.mxu0 %vm491_vm5, %v492_v38  ;;  %v194_v4 = vsel %vm192_vm8, %v191_v21, %v189_v28 }
 0x1cb   :  { %v217_v46 = vpop.permute.xlu1 %216  ;;  %1141 = vmatprep.subr.msk.mxu1 %vm170_vm7, %v167_v42  ;;  %v215_v5 = vpop.permute.xlu0 %214  ;;  %1201 = vset.pattern.permute.xlu1 %v1250_v41 }
 0x1cc   :  { %1142 = vmatpush2.msk.msra.mxu1 %vm169_vm9, %v168_v45  ;;  %v219_v49 = vsel %vm218_vm2, %v215_v5, %v217_v46  ;;  %v220_v51 = vsel %vm218_vm2, %v217_v46, %v215_v5  ;;  %1202 = vset.pattern.permute.xlu0 %v1250_v41 }
 0x1cd   :  { %1143 = vmatprep.subr.msk.mxu1 %vm196_vm4, %v193_v47 }
 0x1ce   :  { %1144 = vmatpush2.msk.msra.mxu1 %vm195_vm10, %v194_v4 }
 0x1cf   :  { %v464_v53 = vpop.permute.xlu1 %463  ;;  %1145 = vmatprep.subr.msk.mxu1 %vm222_vm12, %v219_v49  ;;  %v462_v54 = vpop.permute.xlu0 %461 }
 0x1d0   :  { %v466_v55 = vsel %vm465_vm13, %v462_v54, %v464_v53  ;;  %v467_v58 = vsel %vm465_vm13, %v464_v53, %v462_v54  ;;  %1146 = vmatpush2.msk.msra.mxu1 %vm221_vm11, %v220_v51 }
 0x1d1   :  { %815 = vmatmul.mubr.f32.vlgmr.msra.gmra.mxu1 %v645_v50  ;;  %1159 = vmatprep.subr.msk.mxu0 %vm469_vm14, %v467_v58 }
 0x1d2   :  { %1160 = vmatpush1.msk.msra.mxu0 %vm465_vm13, %v466_v55  ;;  %820 = vmatprep.mubr.f32.mxu1 %v649_v56 }
 0x1d3   :  { %1081 = vmatmul.mubr.msk.f32.vlgmr.msra.gmra.mxu0 %vm737_vm15, %v647_v57 }
 0x1d4   :  { %909 = vmatprep.mubr.f32.mxu0 %v1211_v2 }
 0x1d5   :  { %821 = vmatmul.mubr.f32.gmra.mxu1 %v648_v26 }
 0x1d6   :  { %826 = vmatprep.mubr.f32.mxu1 %v652_v60 }
 0x1d7   :  { %1082 = vmatmul.mubr.msk.f32.gmra.mxu0 %vm737_vm15, %v650_v62 }
 0x1d8   :  { %915 = vmatprep.mubr.f32.mxu0 %v1211_v2 }
 0x1d9   :  { %827 = vmatmul.mubr.f32.gmra.mxu1 %v651_v11 }
 0x1da   :  { %832 = vmatprep.mubr.f32.mxu1 %v655_v32 }
 0x1db   :  { %1083 = vmatmul.mubr.msk.f32.gmra.mxu0 %vm737_vm15, %v653_v59 }
 0x1dc   :  { %921 = vmatprep.mubr.f32.mxu0 %v1211_v2 }
 0x1dd   :  { %833 = vmatmul.mubr.f32.gmra.mxu1 %v654_v3 }
 0x1df   :  { %1084 = vmatmul.mubr.msk.f32.gmra.mxu0 %vm737_vm15, %v656_v61 }
 0x291   :  { %v816_v9 = vpop.f32.mrf.mxu1 }
 0x293   :  { %v818_v36 = vpop.f32.mrf.mxu1  ;;  %v905_v39 = vpop.f32.mrf.mxu0 }
 0x294   :  { %v1909_v40 = vadd.f32 %v905_v39, %v816_v9 }
 0x295   :  { %v822_v43 = vpop.f32.mrf.mxu1  ;;  %v907_v63 = vpop.f32.mrf.mxu0 }
 0x296   :  { %v1911_v14 = vadd.f32 %v907_v63, %v818_v36  ;;  %v944_v6 = vmul.f32 %v1909_v40, %v1909_v40 }
 0x297   :  { %v824_v8 = vpop.f32.mrf.mxu1  ;;  %v911_v18 = vpop.f32.mrf.mxu0 }
 0x298   :  { %v1913_v44 = vadd.f32 %v911_v18, %v822_v43  ;;  %v928_v2 = vadd.f32 %v1911_v14, %v1909_v40  ;;  %v945_v10 = vmul.f32 %v1911_v14, %v1911_v14  ;;  %v976_v43 = vld [vmem:[%s2008_s3] sm:$0xff] }
 0x299   :  { %v913_v48 = vpop.f32.mrf.mxu0  ;;  %v828_v13 = vpop.f32.mrf.mxu1 }
 0x29a   :  { %v1921_v23 = vadd.f32 %v913_v48, %v824_v8  ;;  %929 = vadd.xlane.f32.xlu0 %v928_v2  ;;  %v952_v15 = vadd.f32 %v945_v10, %v944_v6  ;;  %v946_v22 = vmul.f32 %v1913_v44, %v1913_v44  ;;  %v992_v6 = vld [vmem:[%s2009_s4] sm:$0xff]  ;;  %v977_v48 = vld [vmem:[%s2008_s3 + $0x8] sm:$0xff] }
 0x29b   :  { %v917_v30 = vpop.f32.mrf.mxu0  ;;  %v830_v52 = vpop.f32.mrf.mxu1 }
 0x29c   :  { %v1923_v19 = vadd.f32 %v917_v30, %v828_v13  ;;  %953 = vadd.xlane.f32.xlu1 %v952_v15  ;;  %v947_v35 = vmul.f32 %v1921_v23, %v1921_v23  ;;  %v931_v16 = vadd.f32 %v1921_v23, %v1913_v44 }
 0x29d   :  { %v919_v27 = vpop.f32.mrf.mxu0  ;;  %v834_v7 = vpop.f32.mrf.mxu1 }
 0x29e   :  { %v1929_v1 = vadd.f32 %v919_v27, %v830_v52  ;;  %v955_v0 = vadd.f32 %v947_v35, %v946_v22  ;;  %v948_v31 = vmul.f32 %v1923_v19, %v1923_v19  ;;  %v978_v52 = vld [vmem:[%s2008_s3 + $0x10] sm:$0xff] }
 0x29f   :  { %v923_v12 = vpop.f32.mrf.mxu0  ;;  %v836_v17 = vpop.f32.mrf.mxu1 }
 0x2a0   :  { %932 = vadd.xlane.f32.xlu1 %v931_v16  ;;  %956 = vadd.xlane.f32.xlu0 %v955_v0  ;;  %v1935_v20 = vadd.f32 %v923_v12, %v834_v7  ;;  %v949_v21 = vmul.f32 %v1929_v1, %v1929_v1  ;;  %v934_v24 = vadd.f32 %v1929_v1, %v1923_v19  ;;  %v993_v7 = vld [vmem:[%s2009_s4 + $0x8] sm:$0xff] }
 0x2a1   :  { %v925_v28 = vpop.f32.mrf.mxu0 }
 0x2a2   :  { %v1939_v29 = vadd.f32 %v925_v28, %v836_v17  ;;  %v958_v33 = vadd.f32 %v949_v21, %v948_v31  ;;  %v950_v34 = vmul.f32 %v1935_v20, %v1935_v20  ;;  %v979_v31 = vld [vmem:[%s2008_s3 + $0x18] sm:$0xff]  ;;  %v994_v21 = vld [vmem:[%s2009_s4 + $0x10] sm:$0xff] }
 0x2a4   :  { %959 = vadd.xlane.f32.xlu1 %v958_v33  ;;  %935 = vadd.xlane.f32.xlu0 %v934_v24  ;;  %v937_v25 = vadd.f32 %v1939_v29, %v1935_v20  ;;  %v951_v37 = vmul.f32 %v1939_v29, %v1939_v29  ;;  %v995_v24 = vld [vmem:[%s2009_s4 + $0x18] sm:$0xff] }
 0x2a6   :  { %v961_v38 = vadd.f32 %v951_v37, %v950_v34 }
 0x2a8   :  { %938 = vadd.xlane.f32.xlu0 %v937_v25 }
 0x2ac   :  { %962 = vadd.xlane.f32.xlu0 %v961_v38 }
 0x323   :  { %v930_v42 = vpop.xlane.xlu0 %929 }
 0x324   :  { %v940_v45 = vmul.f32 0.00390625, %v930_v42 }
 0x325   :  { %v954_v46 = vpop.xlane.xlu1 %953 }
 0x326   :  { %v968_v5 = vmul.f32 %v940_v45, %v940_v45  ;;  %v964_v47 = vmul.f32 0.00390625, %v954_v46 }
 0x328   :  { %v972_v4 = vsub.f32 %v964_v47, %v968_v5 }
 0x329   :  { %v933_v49 = vpop.xlane.xlu1 %932  ;;  %v957_v50 = vpop.xlane.xlu0 %956 }
 0x32a   :  { %v980_v51 = vadd.f32 1e-05, %v972_v4  ;;  %v941_v53 = vmul.f32 0.00390625, %v933_v49  ;;  %v965_v56 = vmul.f32 0.00390625, %v957_v50 }
 0x32c   :  { %1203 = vrsqrt.f32 %v980_v51  ;;  %v969_v54 = vmul.f32 %v941_v53, %v941_v53 }
 0x32d   :  { %v960_v55 = vpop.xlane.xlu1 %959  ;;  %v936_v58 = vpop.xlane.xlu0 %935 }
 0x32e   :  { %v973_v57 = vsub.f32 %v965_v56, %v969_v54  ;;  %v942_v26 = vmul.f32 0.00390625, %v936_v58  ;;  %v966_v62 = vmul.f32 0.00390625, %v960_v55 }
 0x330   :  { %v981_v60 = vadd.f32 1e-05, %v973_v57  ;;  %v970_v11 = vmul.f32 %v942_v26, %v942_v26 }
 0x331   :  { %v939_v32 = vpop.xlane.xlu0 %938 }
 0x332   :  { %1205 = vrsqrt.f32 %v981_v60  ;;  %v974_v59 = vsub.f32 %v966_v62, %v970_v11  ;;  %v943_v3 = vmul.f32 0.00390625, %v939_v32 }
 0x334   :  { %v982_v61 = vadd.f32 1e-05, %v974_v59  ;;  %v971_v36 = vmul.f32 %v943_v3, %v943_v3 }
 0x335   :  { %v963_v9 = vpop.xlane.xlu0 %962 }
 0x336   :  { %1207 = vrsqrt.f32 %v982_v61  ;;  %v967_v39 = vmul.f32 0.00390625, %v963_v9 }
 0x338   :  { %v975_v63 = vsub.f32 %v967_v39, %v971_v36 }
 0x339   :  { %v1204_v8 = vpop.eup %1203 }
 0x33a   :  { %v983_v18 = vadd.f32 1e-05, %v975_v63  ;;  %v988_v2 = vmul.f32 %v1204_v8, %v976_v43 }
 0x33c   :  { %1209 = vrsqrt.f32 %v983_v18  ;;  %1006 = vperm.xlu1 %1201, %v988_v2   ;;  %v996_v10 = vmul.f32 %v988_v2, %v940_v45 }
 0x33e   :  { %v1000_v13 = vsub.f32 %v992_v6, %v996_v10 }
 0x33f   :  { %v1206_v15 = vpop.eup %1205 }
 0x340   :  { %1034 = vperm.xlu1 %1201, %v1000_v13   ;;  %v989_v30 = vmul.f32 %v1206_v15, %v977_v48 }
 0x342   :  { %1011 = vperm.xlu0 %1202, %v989_v30   ;;  %v997_v27 = vmul.f32 %v989_v30, %v941_v53 }
 0x343   :  { %v1208_v22 = vpop.eup %1207 }
 0x344   :  { %v990_v35 = vmul.f32 %v1208_v22, %v978_v52  ;;  %v1001_v16 = vsub.f32 %v993_v7, %v997_v27 }
 0x346   :  { %1016 = vperm.xlu1 %1201, %v990_v35   ;;  %v998_v12 = vmul.f32 %v990_v35, %v942_v26 }
 0x348   :  { %v1002_v33 = vsub.f32 %v994_v21, %v998_v12 }
 0x349   :  { %v1210_v0 = vpop.eup %1209 }
 0x34a   :  { %1039 = vperm.xlu1 %1201, %v1001_v16   ;;  %v991_v17 = vmul.f32 %v1210_v0, %v979_v31 }
 0x34c   :  { %v999_v28 = vmul.f32 %v991_v17, %v943_v3 }
 0x34e   :  { %1021 = vperm.xlu1 %1201, %v991_v17   ;;  %v1003_v25 = vsub.f32 %v995_v24, %v999_v28 }
 0x352   :  { %1044 = vperm.xlu1 %1201, %v1002_v33  }
 0x356   :  { %1049 = vperm.xlu1 %1201, %v1003_v25  }
 0x3b7   :  { %v1007_v34 = vpop.permute.xlu1 %1006 }
 0x3b8   :  { %v1024_v37 = vmul.f32 %v1007_v34, %v1909_v40  ;;  %v1025_v38 = vmul.f32 %v1007_v34, %v1911_v14 }
 0x3bb   :  { %v1035_v41 = vpop.permute.xlu1 %1034 }
 0x3bc   :  { %v1052_v42 = vadd.f32 %v1035_v41, %v1024_v37  ;;  %v1053_v45 = vadd.f32 %v1035_v41, %v1025_v38 }
 0x3bd   :  { %v1012_v47 = vpop.permute.xlu0 %1011 }
 0x3be   :  { %v1060_v46 = vmax.f32 %v1052_v42, 0.0  ;;  %v1061_v5 = vmax.f32 %v1053_v45, 0.0  ;;  %v1026_v49 = vmul.f32 %v1012_v47, %v1913_v44  ;;  %v1027_v40 = vmul.f32 %v1012_v47, %v1921_v23 }
 0x3c0   :  { %1068 = vst [vmem:[%s2010_s5] sm:$0xff] %v1060_v46  ;;  %1069 = vst [vmem:[%s2010_s5 + $0x8] sm:$0xff] %v1061_v5 }
 0x3c1   :  { %v1017_v4 = vpop.permute.xlu1 %1016 }
 0x3c2   :  { %v1028_v55 = vmul.f32 %v1017_v4, %v1923_v19  ;;  %v1029_v44 = vmul.f32 %v1017_v4, %v1929_v1 }
 0x3c5   :  { %v1040_v14 = vpop.permute.xlu1 %1039 }
 0x3c6   :  { %v1054_v50 = vadd.f32 %v1040_v14, %v1026_v49  ;;  %v1055_v51 = vadd.f32 %v1040_v14, %v1027_v40 }
 0x3c8   :  { %v1062_v53 = vmax.f32 %v1054_v50, 0.0  ;;  %v1063_v54 = vmax.f32 %v1055_v51, 0.0 }
 0x3c9   :  { %v1022_v56 = vpop.permute.xlu1 %1021 }
 0x3ca   :  { %1070 = vst [vmem:[%s2010_s5 + $0x10] sm:$0xff] %v1062_v53  ;;  %1071 = vst [vmem:[%s2010_s5 + $0x18] sm:$0xff] %v1063_v54  ;;  %v1030_v26 = vmul.f32 %v1022_v56, %v1935_v20  ;;  %v1031_v60 = vmul.f32 %v1022_v56, %v1939_v29 }
 0x3cd   :  { %v1045_v58 = vpop.permute.xlu1 %1044 }
 0x3ce   :  { %v1056_v23 = vadd.f32 %v1045_v58, %v1028_v55  ;;  %v1057_v57 = vadd.f32 %v1045_v58, %v1029_v44 }
 0x3d0   :  { %v1064_v62 = vmax.f32 %v1056_v23, 0.0  ;;  %v1065_v11 = vmax.f32 %v1057_v57, 0.0 }
 0x3d1   :  { %v1050_v32 = vpop.permute.xlu1 %1049 }
 0x3d2   :  { %1072 = vst [vmem:[%s2010_s5 + $0x20] sm:$0xff] %v1064_v62  ;;  %1073 = vst [vmem:[%s2010_s5 + $0x28] sm:$0xff] %v1065_v11  ;;  %v1058_v19 = vadd.f32 %v1050_v32, %v1030_v26  ;;  %v1059_v1 = vadd.f32 %v1050_v32, %v1031_v60 }
 0x3d4   :  { %v1066_v59 = vmax.f32 %v1058_v19, 0.0  ;;  %v1067_v3 = vmax.f32 %v1059_v1, 0.0 }
 0x3d6   :  { %1074 = vst [vmem:[%s2010_s5 + $0x30] sm:$0xff] %v1066_v59  ;;  %1075 = vst [vmem:[%s2010_s5 + $0x38] sm:$0xff] %v1067_v3 }

</bundles_post_ra>
